<compile_context>
chip_gen: v5e
topology: v5e:2x2
jax: 0.10.0
libtpu: 0.0.40
codegen_flags: <defaults>
</compile_context>

<pallas_src>
import functools
import math

import jax
import jax.numpy as jnp
from jax.experimental import pallas as pl
from jax.experimental.pallas import tpu as pltpu


def _round_up(x, m):
    return ((x + m - 1) // m) * m


# ----------------------------- Pallas kernels ------------------------------

def _conv3x3_s2_relu_kernel(x00_ref, x01_ref, x10_ref, x11_ref,
                            x20_ref, x21_ref, w_ref, b_ref, o_ref, *,
                            cin, cout):
    """Fused 3x3 / stride-2 conv + bias + ReLU on one (batch, time-tile) block.

    x{kh}{s}_ref : (M, 2*cin) bf16.  Rows are (t, j) output positions
                   flattened; columns hold the two adjacent input width
                   columns (2*j + s*2 + {0,1}) of input row 2*t + kh.
                   Tap (kh, kw) therefore reads source x[kh][kw // 2],
                   channel range [(kw % 2) * cin, (kw % 2 + 1) * cin).
    w_ref        : (3, 3, cin, cout) bf16
    b_ref        : (1, cout) f32
    o_ref        : (M, cout) bf16
    """
    srcs = ((x00_ref, x01_ref), (x10_ref, x11_ref), (x20_ref, x21_ref))
    m = o_ref.shape[0]
    acc = jnp.zeros((m, cout), jnp.float32)
    for kh in range(3):
        for kw in range(3):
            xt = srcs[kh][kw // 2][:, (kw % 2) * cin:(kw % 2 + 1) * cin]
            wt = w_ref[kh, kw]                                   # (cin, cout)
            if cin == 1:
                # K == 1: broadcast FMA on the VPU (MXU pass would be empty).
                acc = acc + xt.astype(jnp.float32) * wt.astype(jnp.float32)
            else:
                acc = acc + jnp.dot(xt, wt,
                                    preferred_element_type=jnp.float32)
    y = jnp.maximum(acc + b_ref[...], 0.0)
    o_ref[...] = y.astype(o_ref.dtype)


def _head_kernel(h_ref, lip_ref, w1_ref, b1_ref, w2a_ref, w2b_ref, b2_ref,
                 pe_ref, o_ref, *, xscale):
    """Fused out1 -> split out2 -> *sqrt(d) -> +PE on one (batch, time) tile."""
    y1 = jnp.dot(h_ref[...], w1_ref[...],
                 preferred_element_type=jnp.float32) + b1_ref[...]
    y = jnp.dot(y1.astype(jnp.bfloat16), w2a_ref[...],
                preferred_element_type=jnp.float32)
    y = y + jnp.dot(lip_ref[...], w2b_ref[...],
                    preferred_element_type=jnp.float32)
    y = y + b2_ref[...]
    o_ref[...] = (y * xscale + pe_ref[...]).astype(o_ref.dtype)


# ------------------------------- wrappers -----------------------------------

def _conv3x3_s2_relu(x, w, b, h_valid, w_valid, *, max_th=32):
    """Conv2d(k=3, s=2, no padding) + ReLU, NHWC, bf16 activations.

    x : (B, H, W, C) bf16 (may be padded past (h_valid, w_valid); the padded
        region is never read by valid outputs).
    w : (3, 3, C, Cout) bf16;   b : (1, Cout) f32.
    Returns (out, Ho, Wo): out is (B, Ho_pad, Wo_pad, Cout) bf16 whose
    [:, :Ho, :Wo, :] region is valid.
    """
    B, H, W, C = x.shape
    Cout = w.shape[-1]
    Ho = (h_valid - 3) // 2 + 1
    Wo = (w_valid - 3) // 2 + 1
    Wo_pad = _round_up(Wo, 8)                 # keeps row-tiles 8-aligned
    TH = Ho if Ho <= max_th else max_th       # time rows per grid step
    Ho_pad = _round_up(Ho, TH)

    pad_h = max(0, 2 * Ho_pad + 1 - H)
    pad_w = max(0, 2 * Wo_pad + 2 - W)
    if (W + pad_w) % 2:
        pad_w += 1
    xp = jnp.pad(x, ((0, 0), (0, pad_h), (0, pad_w), (0, 0)))
    Wp1 = (W + pad_w) // 2
    # Free reshape: pair adjacent width columns into the channel/lane dim.
    xp = xp.reshape(B, H + pad_h, Wp1, 2 * C)

    M = Ho_pad * Wo_pad
    TM = TH * Wo_pad

    def tap(kh, s):
        r = xp[:, kh:kh + 2 * Ho_pad:2, s:s + Wo_pad, :]   # (B, Ho_pad, Wo_pad, 2C)
        return r.reshape(B, M, 2 * C)                      # free reshape

    taps = [tap(kh, s) for kh in range(3) for s in range(2)]

    x_spec = pl.BlockSpec((None, TM, 2 * C), lambda bi, ti: (bi, ti, 0))
    out = pl.pallas_call(
        functools.partial(_conv3x3_s2_relu_kernel, cin=C, cout=Cout),
        out_shape=jax.ShapeDtypeStruct((B, M, Cout), jnp.bfloat16),
        grid=(B, Ho_pad // TH),
        in_specs=[x_spec] * 6 + [
            pl.BlockSpec((3, 3, C, Cout), lambda bi, ti: (0, 0, 0, 0)),
            pl.BlockSpec((1, Cout), lambda bi, ti: (0, 0)),
        ],
        out_specs=pl.BlockSpec((None, TM, Cout), lambda bi, ti: (bi, ti, 0)),
        compiler_params=pltpu.CompilerParams(
            dimension_semantics=("parallel", "parallel")),
    )(*taps, w, b)
    return out.reshape(B, Ho_pad, Wo_pad, Cout), Ho, Wo    # free reshape


def _head(h, lip, w1, b1, w2a, w2b, b2, pe, xscale, *, max_tm=128):
    """Fused out1 + out2(cat(., lip)) + xscale + positional encoding."""
    B, Tp, K1 = h.shape
    odim = b2.shape[-1]
    TM = Tp if Tp <= max_tm else max_tm
    Tp_pad = _round_up(Tp, TM)
    if Tp_pad != Tp:
        h = jnp.pad(h, ((0, 0), (0, Tp_pad - Tp), (0, 0)))
        lip = jnp.pad(lip, ((0, 0), (0, Tp_pad - Tp), (0, 0)))
        pe = jnp.pad(pe, ((0, Tp_pad - Tp), (0, 0)))

    out = pl.pallas_call(
        functools.partial(_head_kernel, xscale=xscale),
        out_shape=jax.ShapeDtypeStruct((B, Tp_pad, odim), jnp.float32),
        grid=(B, Tp_pad // TM),
        in_specs=[
            pl.BlockSpec((None, TM, K1), lambda bi, ti: (bi, ti, 0)),
            pl.BlockSpec((None, TM, 2 * odim), lambda bi, ti: (bi, ti, 0)),
            pl.BlockSpec((K1, 2 * odim), lambda bi, ti: (0, 0)),
            pl.BlockSpec((1, 2 * odim), lambda bi, ti: (0, 0)),
            pl.BlockSpec((2 * odim, odim), lambda bi, ti: (0, 0)),
            pl.BlockSpec((2 * odim, odim), lambda bi, ti: (0, 0)),
            pl.BlockSpec((1, odim), lambda bi, ti: (0, 0)),
            pl.BlockSpec((TM, odim), lambda bi, ti: (ti, 0)),   # PE shared over batch
        ],
        out_specs=pl.BlockSpec((None, TM, odim), lambda bi, ti: (bi, ti, 0)),
        compiler_params=pltpu.CompilerParams(
            dimension_semantics=("parallel", "parallel")),
    )(h, lip, w1, b1, w2a, w2b, b2, pe)
    return out[:, :Tp, :]


def _positional_encoding(T, d):
    pos = jnp.arange(T, dtype=jnp.float32)[:, None]
    div = jnp.exp(jnp.arange(0, d, 2, dtype=jnp.float32) * -(math.log(10000.0) / d))
    return jnp.stack([jnp.sin(pos * div), jnp.cos(pos * div)], axis=-1).reshape(T, d)


def conv2d_av_subsampling(x, x_mask, lip, params):
    """Forward pass of Conv2dAVSubsampling.

    x: (B, T, idim) f32; x_mask: (B, 1, T) bool; lip: (B, T_lip, 2*odim) f32.
    Returns (y, mask): y (B, T', odim) f32, mask (B, 1, T') bool.
    """
    B, T, idim = x.shape
    odim = params["b_out2"].shape[0]
    cdt = jnp.bfloat16

    # one-off parameter prep: torch (Cout, Cin, 3, 3) -> (3, 3, Cin, Cout), bf16
    w1 = jnp.transpose(params["w1"], (2, 3, 1, 0)).astype(cdt)
    w2 = jnp.transpose(params["w2"], (2, 3, 1, 0)).astype(cdt)
    b1 = params["b1"].reshape(1, -1).astype(jnp.float32)
    b2 = params["b2"].reshape(1, -1).astype(jnp.float32)

    # conv stack, NHWC end-to-end, bf16 activations
    h = x.astype(cdt)[..., None]                               # (B, T, idim, 1)
    h, T1, F1 = _conv3x3_s2_relu(h, w1, b1, T, idim)           # (B, T1p, F1p, odim)
    h, T2, F2 = _conv3x3_s2_relu(h, w2, b2, T1, F1)            # (B, T2p, F2p, odim)

    # valid region, channel-last flatten (B, T2, F2*odim); reshape is free
    h = h[:, :T2, :F2, :].reshape(B, T2, F2 * odim)

    # out1 expects torch's (channel-major, freq-minor) flatten; permute its
    # rows once instead of transposing the activation tensor.
    w_o1 = (params["w_out1"].reshape(odim, F2, 2 * odim)
            .transpose(1, 0, 2).reshape(F2 * odim, 2 * odim).astype(cdt))
    b_o1 = params["b_out1"].reshape(1, -1).astype(jnp.float32)
    w_o2a = params["w_out2"][:2 * odim].astype(cdt)
    w_o2b = params["w_out2"][2 * odim:].astype(cdt)
    b_o2 = params["b_out2"].reshape(1, -1).astype(jnp.float32)

    m = x_mask[:, :, :-2:2][:, :, :-2:2]

    # tail-frame replication to match the lip stream (same logic as PyTorch)
    h = jnp.concatenate([h, h[:, -1:, :]], axis=1)
    m = jnp.concatenate([m, m[:, :, -1:]], axis=2)
    if h.shape[1] != lip.shape[1]:
        h = jnp.concatenate([h, h[:, -1:, :]], axis=1)
        m = jnp.concatenate([m, m[:, :, -1:]], axis=2)
    if h.shape[1] != lip.shape[1]:
        lip = lip[:, :h.shape[1], :]

    Tp = h.shape[1]
    pe = _positional_encoding(Tp, odim)
    y = _head(h, lip.astype(cdt), w_o1, b_o1, w_o2a, w_o2b, b_o2, pe,
              math.sqrt(odim))
    return y, m


def init_params(key, idim, odim):
    f_sub = ((idim - 1) // 2 - 1) // 2
    ks = jax.random.split(key, 8)
    s = 0.1
    return {
        "w1": jax.random.normal(ks[0], (odim, 1, 3, 3), jnp.float32) * s,
        "b1": jax.random.normal(ks[1], (odim,), jnp.float32) * s,
        "w2": jax.random.normal(ks[2], (odim, odim, 3, 3), jnp.float32) * s,
        "b2": jax.random.normal(ks[3], (odim,), jnp.float32) * s,
        "w_out1": jax.random.normal(ks[4], (odim * f_sub, odim * 2), jnp.float32) * s,
        "b_out1": jax.random.normal(ks[5], (odim * 2,), jnp.float32) * s,
        "w_out2": jax.random.normal(ks[6], (odim * 4, odim), jnp.float32) * s,
        "b_out2": jax.random.normal(ks[7], (odim,), jnp.float32) * s,
    }


if __name__ == "__main__":
    B, T, idim, odim = 2, 16, 16, 32
    T2 = ((T - 1) // 2 - 1) // 2           # time after two stride-2 convs
    T_lip = T2 + 1                         # matches x after one tail-frame append

    key = jax.random.PRNGKey(0)
    k_x, k_lip, k_p = jax.random.split(key, 3)

    x = jax.random.normal(k_x, (B, T, idim), jnp.float32)
    x_mask = jnp.ones((B, 1, T), dtype=jnp.bool_)
    lip = jax.random.normal(k_lip, (B, T_lip, odim * 2), jnp.float32)
    params = init_params(k_p, idim, odim)

    fwd = jax.jit(conv2d_av_subsampling)
    y, m = fwd(x, x_mask, lip, params)
    y = jax.block_until_ready(y)
    m = jax.block_until_ready(m)

    assert y.shape == (B, T_lip, odim), y.shape
    assert m.shape == (B, 1, T_lip), m.shape
    print("KERNEL_OK")
</pallas_src>

<mosaic_0001>
module attributes {stable_mosaic.version = 11 : i64} {
  func.func @_conv3x3_s2_relu_kernel(%arg0: i32, %arg1: i32, %arg2: memref<1x56x2xbf16, #tpu.memory_space<vmem>>, %arg3: memref<1x56x2xbf16, #tpu.memory_space<vmem>>, %arg4: memref<1x56x2xbf16, #tpu.memory_space<vmem>>, %arg5: memref<1x56x2xbf16, #tpu.memory_space<vmem>>, %arg6: memref<1x56x2xbf16, #tpu.memory_space<vmem>>, %arg7: memref<1x56x2xbf16, #tpu.memory_space<vmem>>, %arg8: memref<3x3x1x32xbf16, #tpu.memory_space<vmem>>, %arg9: memref<1x32xf32, #tpu.memory_space<vmem>>, %arg10: memref<1x56x32xbf16, #tpu.memory_space<vmem>>) attributes {dimension_semantics = [#tpu.dimension_semantics<parallel>, #tpu.dimension_semantics<parallel>], iteration_bounds = array<i64: 2, 1>, scalar_prefetch = 0 : i64, scratch_operands = 0 : i64, tpu.core_type = #tpu.core_type<tc>, window_params = [{transform_indices = @transform_0, window_bounds = array<i64: 1, 56, 2>}, {transform_indices = @transform_1, window_bounds = array<i64: 1, 56, 2>}, {transform_indices = @transform_2, window_bounds = array<i64: 1, 56, 2>}, {transform_indices = @transform_3, window_bounds = array<i64: 1, 56, 2>}, {transform_indices = @transform_4, window_bounds = array<i64: 1, 56, 2>}, {transform_indices = @transform_5, window_bounds = array<i64: 1, 56, 2>}, {pipeline_mode = #tpu.pipeline_mode<synchronous>, transform_indices = @transform_6, window_bounds = array<i64: 3, 3, 1, 32>}, {pipeline_mode = #tpu.pipeline_mode<synchronous>, transform_indices = @transform_7, window_bounds = array<i64: 1, 32>}, {transform_indices = @transform_8, window_bounds = array<i64: 1, 56, 32>}]} {
    %cst = arith.constant 0.000000e+00 : f32
    %0 = vector.broadcast %cst : f32 to vector<56x32xf32>
    %c0 = arith.constant 0 : index
    %c0_0 = arith.constant 0 : index
    %c0_1 = arith.constant 0 : index
    %1 = vector.load %arg2[%c0, %c0_0, %c0_1] : memref<1x56x2xbf16, #tpu.memory_space<vmem>>, vector<1x56x1xbf16>
    %2 = vector.shape_cast %1 : vector<1x56x1xbf16> to vector<56x1xbf16>
    %c0_2 = arith.constant 0 : index
    %c0_3 = arith.constant 0 : index
    %c0_4 = arith.constant 0 : index
    %c0_5 = arith.constant 0 : index
    %3 = vector.load %arg8[%c0_2, %c0_3, %c0_4, %c0_5] : memref<3x3x1x32xbf16, #tpu.memory_space<vmem>>, vector<1x1x1x32xbf16>
    %4 = vector.shape_cast %3 : vector<1x1x1x32xbf16> to vector<1x32xbf16>
    %5 = arith.extf %2 : vector<56x1xbf16> to vector<56x1xf32>
    %6 = arith.extf %4 : vector<1x32xbf16> to vector<1x32xf32>
    %7 = vector.broadcast %5 : vector<56x1xf32> to vector<56x32xf32>
    %8 = vector.broadcast %6 : vector<1x32xf32> to vector<56x32xf32>
    %9 = arith.mulf %7, %8 : vector<56x32xf32>
    %10 = arith.addf %0, %9 : vector<56x32xf32>
    %c0_6 = arith.constant 0 : index
    %c0_7 = arith.constant 0 : index
    %c1 = arith.constant 1 : index
    %11 = vector.load %arg2[%c0_6, %c0_7, %c1] : memref<1x56x2xbf16, #tpu.memory_space<vmem>>, vector<1x56x1xbf16>
    %12 = vector.shape_cast %11 : vector<1x56x1xbf16> to vector<56x1xbf16>
    %c0_8 = arith.constant 0 : index
    %c1_9 = arith.constant 1 : index
    %c0_10 = arith.constant 0 : index
    %c0_11 = arith.constant 0 : index
    %13 = vector.load %arg8[%c0_8, %c1_9, %c0_10, %c0_11] : memref<3x3x1x32xbf16, #tpu.memory_space<vmem>>, vector<1x1x1x32xbf16>
    %14 = vector.shape_cast %13 : vector<1x1x1x32xbf16> to vector<1x32xbf16>
    %15 = arith.extf %12 : vector<56x1xbf16> to vector<56x1xf32>
    %16 = arith.extf %14 : vector<1x32xbf16> to vector<1x32xf32>
    %17 = vector.broadcast %15 : vector<56x1xf32> to vector<56x32xf32>
    %18 = vector.broadcast %16 : vector<1x32xf32> to vector<56x32xf32>
    %19 = arith.mulf %17, %18 : vector<56x32xf32>
    %20 = arith.addf %10, %19 : vector<56x32xf32>
    %c0_12 = arith.constant 0 : index
    %c0_13 = arith.constant 0 : index
    %c0_14 = arith.constant 0 : index
    %21 = vector.load %arg3[%c0_12, %c0_13, %c0_14] : memref<1x56x2xbf16, #tpu.memory_space<vmem>>, vector<1x56x1xbf16>
    %22 = vector.shape_cast %21 : vector<1x56x1xbf16> to vector<56x1xbf16>
    %c0_15 = arith.constant 0 : index
    %c2 = arith.constant 2 : index
    %c0_16 = arith.constant 0 : index
    %c0_17 = arith.constant 0 : index
    %23 = vector.load %arg8[%c0_15, %c2, %c0_16, %c0_17] : memref<3x3x1x32xbf16, #tpu.memory_space<vmem>>, vector<1x1x1x32xbf16>
    %24 = vector.shape_cast %23 : vector<1x1x1x32xbf16> to vector<1x32xbf16>
    %25 = arith.extf %22 : vector<56x1xbf16> to vector<56x1xf32>
    %26 = arith.extf %24 : vector<1x32xbf16> to vector<1x32xf32>
    %27 = vector.broadcast %25 : vector<56x1xf32> to vector<56x32xf32>
    %28 = vector.broadcast %26 : vector<1x32xf32> to vector<56x32xf32>
    %29 = arith.mulf %27, %28 : vector<56x32xf32>
    %30 = arith.addf %20, %29 : vector<56x32xf32>
    %c0_18 = arith.constant 0 : index
    %c0_19 = arith.constant 0 : index
    %c0_20 = arith.constant 0 : index
    %31 = vector.load %arg4[%c0_18, %c0_19, %c0_20] : memref<1x56x2xbf16, #tpu.memory_space<vmem>>, vector<1x56x1xbf16>
    %32 = vector.shape_cast %31 : vector<1x56x1xbf16> to vector<56x1xbf16>
    %c1_21 = arith.constant 1 : index
    %c0_22 = arith.constant 0 : index
    %c0_23 = arith.constant 0 : index
    %c0_24 = arith.constant 0 : index
    %33 = vector.load %arg8[%c1_21, %c0_22, %c0_23, %c0_24] : memref<3x3x1x32xbf16, #tpu.memory_space<vmem>>, vector<1x1x1x32xbf16>
    %34 = vector.shape_cast %33 : vector<1x1x1x32xbf16> to vector<1x32xbf16>
    %35 = arith.extf %32 : vector<56x1xbf16> to vector<56x1xf32>
    %36 = arith.extf %34 : vector<1x32xbf16> to vector<1x32xf32>
    %37 = vector.broadcast %35 : vector<56x1xf32> to vector<56x32xf32>
    %38 = vector.broadcast %36 : vector<1x32xf32> to vector<56x32xf32>
    %39 = arith.mulf %37, %38 : vector<56x32xf32>
    %40 = arith.addf %30, %39 : vector<56x32xf32>
    %c0_25 = arith.constant 0 : index
    %c0_26 = arith.constant 0 : index
    %c1_27 = arith.constant 1 : index
    %41 = vector.load %arg4[%c0_25, %c0_26, %c1_27] : memref<1x56x2xbf16, #tpu.memory_space<vmem>>, vector<1x56x1xbf16>
    %42 = vector.shape_cast %41 : vector<1x56x1xbf16> to vector<56x1xbf16>
    %c1_28 = arith.constant 1 : index
    %c1_29 = arith.constant 1 : index
    %c0_30 = arith.constant 0 : index
    %c0_31 = arith.constant 0 : index
    %43 = vector.load %arg8[%c1_28, %c1_29, %c0_30, %c0_31] : memref<3x3x1x32xbf16, #tpu.memory_space<vmem>>, vector<1x1x1x32xbf16>
    %44 = vector.shape_cast %43 : vector<1x1x1x32xbf16> to vector<1x32xbf16>
    %45 = arith.extf %42 : vector<56x1xbf16> to vector<56x1xf32>
    %46 = arith.extf %44 : vector<1x32xbf16> to vector<1x32xf32>
    %47 = vector.broadcast %45 : vector<56x1xf32> to vector<56x32xf32>
    %48 = vector.broadcast %46 : vector<1x32xf32> to vector<56x32xf32>
    %49 = arith.mulf %47, %48 : vector<56x32xf32>
    %50 = arith.addf %40, %49 : vector<56x32xf32>
    %c0_32 = arith.constant 0 : index
    %c0_33 = arith.constant 0 : index
    %c0_34 = arith.constant 0 : index
    %51 = vector.load %arg5[%c0_32, %c0_33, %c0_34] : memref<1x56x2xbf16, #tpu.memory_space<vmem>>, vector<1x56x1xbf16>
    %52 = vector.shape_cast %51 : vector<1x56x1xbf16> to vector<56x1xbf16>
    %c1_35 = arith.constant 1 : index
    %c2_36 = arith.constant 2 : index
    %c0_37 = arith.constant 0 : index
    %c0_38 = arith.constant 0 : index
    %53 = vector.load %arg8[%c1_35, %c2_36, %c0_37, %c0_38] : memref<3x3x1x32xbf16, #tpu.memory_space<vmem>>, vector<1x1x1x32xbf16>
    %54 = vector.shape_cast %53 : vector<1x1x1x32xbf16> to vector<1x32xbf16>
    %55 = arith.extf %52 : vector<56x1xbf16> to vector<56x1xf32>
    %56 = arith.extf %54 : vector<1x32xbf16> to vector<1x32xf32>
    %57 = vector.broadcast %55 : vector<56x1xf32> to vector<56x32xf32>
    %58 = vector.broadcast %56 : vector<1x32xf32> to vector<56x32xf32>
    %59 = arith.mulf %57, %58 : vector<56x32xf32>
    %60 = arith.addf %50, %59 : vector<56x32xf32>
    %c0_39 = arith.constant 0 : index
    %c0_40 = arith.constant 0 : index
    %c0_41 = arith.constant 0 : index
    %61 = vector.load %arg6[%c0_39, %c0_40, %c0_41] : memref<1x56x2xbf16, #tpu.memory_space<vmem>>, vector<1x56x1xbf16>
    %62 = vector.shape_cast %61 : vector<1x56x1xbf16> to vector<56x1xbf16>
    %c2_42 = arith.constant 2 : index
    %c0_43 = arith.constant 0 : index
    %c0_44 = arith.constant 0 : index
    %c0_45 = arith.constant 0 : index
    %63 = vector.load %arg8[%c2_42, %c0_43, %c0_44, %c0_45] : memref<3x3x1x32xbf16, #tpu.memory_space<vmem>>, vector<1x1x1x32xbf16>
    %64 = vector.shape_cast %63 : vector<1x1x1x32xbf16> to vector<1x32xbf16>
    %65 = arith.extf %62 : vector<56x1xbf16> to vector<56x1xf32>
    %66 = arith.extf %64 : vector<1x32xbf16> to vector<1x32xf32>
    %67 = vector.broadcast %65 : vector<56x1xf32> to vector<56x32xf32>
    %68 = vector.broadcast %66 : vector<1x32xf32> to vector<56x32xf32>
    %69 = arith.mulf %67, %68 : vector<56x32xf32>
    %70 = arith.addf %60, %69 : vector<56x32xf32>
    %c0_46 = arith.constant 0 : index
    %c0_47 = arith.constant 0 : index
    %c1_48 = arith.constant 1 : index
    %71 = vector.load %arg6[%c0_46, %c0_47, %c1_48] : memref<1x56x2xbf16, #tpu.memory_space<vmem>>, vector<1x56x1xbf16>
    %72 = vector.shape_cast %71 : vector<1x56x1xbf16> to vector<56x1xbf16>
    %c2_49 = arith.constant 2 : index
    %c1_50 = arith.constant 1 : index
    %c0_51 = arith.constant 0 : index
    %c0_52 = arith.constant 0 : index
    %73 = vector.load %arg8[%c2_49, %c1_50, %c0_51, %c0_52] : memref<3x3x1x32xbf16, #tpu.memory_space<vmem>>, vector<1x1x1x32xbf16>
    %74 = vector.shape_cast %73 : vector<1x1x1x32xbf16> to vector<1x32xbf16>
    %75 = arith.extf %72 : vector<56x1xbf16> to vector<56x1xf32>
    %76 = arith.extf %74 : vector<1x32xbf16> to vector<1x32xf32>
    %77 = vector.broadcast %75 : vector<56x1xf32> to vector<56x32xf32>
    %78 = vector.broadcast %76 : vector<1x32xf32> to vector<56x32xf32>
    %79 = arith.mulf %77, %78 : vector<56x32xf32>
    %80 = arith.addf %70, %79 : vector<56x32xf32>
    %c0_53 = arith.constant 0 : index
    %c0_54 = arith.constant 0 : index
    %c0_55 = arith.constant 0 : index
    %81 = vector.load %arg7[%c0_53, %c0_54, %c0_55] : memref<1x56x2xbf16, #tpu.memory_space<vmem>>, vector<1x56x1xbf16>
    %82 = vector.shape_cast %81 : vector<1x56x1xbf16> to vector<56x1xbf16>
    %c2_56 = arith.constant 2 : index
    %c2_57 = arith.constant 2 : index
    %c0_58 = arith.constant 0 : index
    %c0_59 = arith.constant 0 : index
    %83 = vector.load %arg8[%c2_56, %c2_57, %c0_58, %c0_59] : memref<3x3x1x32xbf16, #tpu.memory_space<vmem>>, vector<1x1x1x32xbf16>
    %84 = vector.shape_cast %83 : vector<1x1x1x32xbf16> to vector<1x32xbf16>
    %85 = arith.extf %82 : vector<56x1xbf16> to vector<56x1xf32>
    %86 = arith.extf %84 : vector<1x32xbf16> to vector<1x32xf32>
    %87 = vector.broadcast %85 : vector<56x1xf32> to vector<56x32xf32>
    %88 = vector.broadcast %86 : vector<1x32xf32> to vector<56x32xf32>
    %89 = arith.mulf %87, %88 : vector<56x32xf32>
    %90 = arith.addf %80, %89 : vector<56x32xf32>
    %c0_60 = arith.constant 0 : index
    %c0_61 = arith.constant 0 : index
    %91 = vector.load %arg9[%c0_60, %c0_61] : memref<1x32xf32, #tpu.memory_space<vmem>>, vector<1x32xf32>
    %92 = vector.broadcast %91 : vector<1x32xf32> to vector<56x32xf32>
    %93 = arith.addf %90, %92 : vector<56x32xf32>
    %cst_62 = arith.constant 0.000000e+00 : f32
    %94 = vector.broadcast %cst_62 : f32 to vector<56x32xf32>
    %95 = arith.maximumf %93, %94 : vector<56x32xf32>
    %96 = arith.truncf %95 : vector<56x32xf32> to vector<56x32xbf16>
    %c0_63 = arith.constant 0 : index
    %c0_64 = arith.constant 0 : index
    %c0_65 = arith.constant 0 : index
    %97 = vector.load %arg10[%c0_63, %c0_64, %c0_65] : memref<1x56x32xbf16, #tpu.memory_space<vmem>>, vector<1x56x32xbf16>
    %98 = vector.shape_cast %97 : vector<1x56x32xbf16> to vector<56x32xbf16>
    %99 = vector.shape_cast %96 : vector<56x32xbf16> to vector<1x56x32xbf16>
    tpu.vector_store %arg10[%c0_63, %c0_64, %c0_65], %99 {strides = array<i32>} : memref<1x56x32xbf16, #tpu.memory_space<vmem>>, vector<1x56x32xbf16>,
    return
  }
  func.func @transform_0(%arg0: i32, %arg1: i32) -> (i32, i32, i32) {
    %c0_i32 = arith.constant 0 : i32
    %c0_i32_0 = arith.constant 0 : i32
    return %arg0, %arg1, %c0_i32 : i32, i32, i32
  }
  func.func @transform_1(%arg0: i32, %arg1: i32) -> (i32, i32, i32) {
    %c0_i32 = arith.constant 0 : i32
    %c0_i32_0 = arith.constant 0 : i32
    return %arg0, %arg1, %c0_i32 : i32, i32, i32
  }
  func.func @transform_2(%arg0: i32, %arg1: i32) -> (i32, i32, i32) {
    %c0_i32 = arith.constant 0 : i32
    %c0_i32_0 = arith.constant 0 : i32
    return %arg0, %arg1, %c0_i32 : i32, i32, i32
  }
  func.func @transform_3(%arg0: i32, %arg1: i32) -> (i32, i32, i32) {
    %c0_i32 = arith.constant 0 : i32
    %c0_i32_0 = arith.constant 0 : i32
    return %arg0, %arg1, %c0_i32 : i32, i32, i32
  }
  func.func @transform_4(%arg0: i32, %arg1: i32) -> (i32, i32, i32) {
    %c0_i32 = arith.constant 0 : i32
    %c0_i32_0 = arith.constant 0 : i32
    return %arg0, %arg1, %c0_i32 : i32, i32, i32
  }
  func.func @transform_5(%arg0: i32, %arg1: i32) -> (i32, i32, i32) {
    %c0_i32 = arith.constant 0 : i32
    %c0_i32_0 = arith.constant 0 : i32
    return %arg0, %arg1, %c0_i32 : i32, i32, i32
  }
  func.func @transform_6(%arg0: i32, %arg1: i32) -> (i32, i32, i32, i32) {
    %c0_i32 = arith.constant 0 : i32
    %c0_i32_0 = arith.constant 0 : i32
    %c0_i32_1 = arith.constant 0 : i32
    %c0_i32_2 = arith.constant 0 : i32
    %c0_i32_3 = arith.constant 0 : i32
    return %c0_i32, %c0_i32_0, %c0_i32_1, %c0_i32_2 : i32, i32, i32, i32
  }
  func.func @transform_7(%arg0: i32, %arg1: i32) -> (i32, i32) {
    %c0_i32 = arith.constant 0 : i32
    %c0_i32_0 = arith.constant 0 : i32
    %c0_i32_1 = arith.constant 0 : i32
    return %c0_i32, %c0_i32_0 : i32, i32
  }
  func.func @transform_8(%arg0: i32, %arg1: i32) -> (i32, i32, i32) {
    %c0_i32 = arith.constant 0 : i32
    %c0_i32_0 = arith.constant 0 : i32
    return %arg0, %arg1, %c0_i32 : i32, i32, i32
  }
}

module attributes {stable_mosaic.version = 11 : i64} {
  func.func @_conv3x3_s2_relu_kernel(%arg0: i32, %arg1: i32, %arg2: memref<1x24x64xbf16, #tpu.memory_space<vmem>>, %arg3: memref<1x24x64xbf16, #tpu.memory_space<vmem>>, %arg4: memref<1x24x64xbf16, #tpu.memory_space<vmem>>, %arg5: memref<1x24x64xbf16, #tpu.memory_space<vmem>>, %arg6: memref<1x24x64xbf16, #tpu.memory_space<vmem>>, %arg7: memref<1x24x64xbf16, #tpu.memory_space<vmem>>, %arg8: memref<3x3x32x32xbf16, #tpu.memory_space<vmem>>, %arg9: memref<1x32xf32, #tpu.memory_space<vmem>>, %arg10: memref<1x24x32xbf16, #tpu.memory_space<vmem>>) attributes {dimension_semantics = [#tpu.dimension_semantics<parallel>, #tpu.dimension_semantics<parallel>], iteration_bounds = array<i64: 2, 1>, scalar_prefetch = 0 : i64, scratch_operands = 0 : i64, tpu.core_type = #tpu.core_type<tc>, window_params = [{transform_indices = @transform_0, window_bounds = array<i64: 1, 24, 64>}, {transform_indices = @transform_1, window_bounds = array<i64: 1, 24, 64>}, {transform_indices = @transform_2, window_bounds = array<i64: 1, 24, 64>}, {transform_indices = @transform_3, window_bounds = array<i64: 1, 24, 64>}, {transform_indices = @transform_4, window_bounds = array<i64: 1, 24, 64>}, {transform_indices = @transform_5, window_bounds = array<i64: 1, 24, 64>}, {pipeline_mode = #tpu.pipeline_mode<synchronous>, transform_indices = @transform_6, window_bounds = array<i64: 3, 3, 32, 32>}, {pipeline_mode = #tpu.pipeline_mode<synchronous>, transform_indices = @transform_7, window_bounds = array<i64: 1, 32>}, {transform_indices = @transform_8, window_bounds = array<i64: 1, 24, 32>}]} {
    %cst = arith.constant 0.000000e+00 : f32
    %0 = vector.broadcast %cst : f32 to vector<24x32xf32>
    %c0 = arith.constant 0 : index
    %c0_0 = arith.constant 0 : index
    %c0_1 = arith.constant 0 : index
    %1 = vector.load %arg2[%c0, %c0_0, %c0_1] : memref<1x24x64xbf16, #tpu.memory_space<vmem>>, vector<1x24x32xbf16>
    %2 = vector.shape_cast %1 : vector<1x24x32xbf16> to vector<24x32xbf16>
    %c0_2 = arith.constant 0 : index
    %c0_3 = arith.constant 0 : index
    %c0_4 = arith.constant 0 : index
    %c0_5 = arith.constant 0 : index
    %3 = vector.load %arg8[%c0_2, %c0_3, %c0_4, %c0_5] : memref<3x3x32x32xbf16, #tpu.memory_space<vmem>>, vector<1x1x32x32xbf16>
    %4 = vector.shape_cast %3 : vector<1x1x32x32xbf16> to vector<32x32xbf16>
    %cst_6 = arith.constant dense<0.000000e+00> : vector<24x32xf32>
    %5 = tpu.matmul %2, %4, %cst_6 {dimension_numbers = #tpu.dot_dimension_numbers<[1], [0], [0], [1], [0, 0, 1, 1], [], []>} : vector<24x32xbf16>, vector<32x32xbf16>, vector<24x32xf32> -> vector<24x32xf32>
    %6 = arith.addf %0, %5 : vector<24x32xf32>
    %c0_7 = arith.constant 0 : index
    %c0_8 = arith.constant 0 : index
    %c32 = arith.constant 32 : index
    %7 = vector.load %arg2[%c0_7, %c0_8, %c32] : memref<1x24x64xbf16, #tpu.memory_space<vmem>>, vector<1x24x32xbf16>
    %8 = vector.shape_cast %7 : vector<1x24x32xbf16> to vector<24x32xbf16>
    %c0_9 = arith.constant 0 : index
    %c1 = arith.constant 1 : index
    %c0_10 = arith.constant 0 : index
    %c0_11 = arith.constant 0 : index
    %9 = vector.load %arg8[%c0_9, %c1, %c0_10, %c0_11] : memref<3x3x32x32xbf16, #tpu.memory_space<vmem>>, vector<1x1x32x32xbf16>
    %10 = vector.shape_cast %9 : vector<1x1x32x32xbf16> to vector<32x32xbf16>
    %cst_12 = arith.constant dense<0.000000e+00> : vector<24x32xf32>
    %11 = tpu.matmul %8, %10, %cst_12 {dimension_numbers = #tpu.dot_dimension_numbers<[1], [0], [0], [1], [0, 0, 1, 1], [], []>} : vector<24x32xbf16>, vector<32x32xbf16>, vector<24x32xf32> -> vector<24x32xf32>
    %12 = arith.addf %6, %11 : vector<24x32xf32>
    %c0_13 = arith.constant 0 : index
    %c0_14 = arith.constant 0 : index
    %c0_15 = arith.constant 0 : index
    %13 = vector.load %arg3[%c0_13, %c0_14, %c0_15] : memref<1x24x64xbf16, #tpu.memory_space<vmem>>, vector<1x24x32xbf16>
    %14 = vector.shape_cast %13 : vector<1x24x32xbf16> to vector<24x32xbf16>
    %c0_16 = arith.constant 0 : index
    %c2 = arith.constant 2 : index
    %c0_17 = arith.constant 0 : index
    %c0_18 = arith.constant 0 : index
    %15 = vector.load %arg8[%c0_16, %c2, %c0_17, %c0_18] : memref<3x3x32x32xbf16, #tpu.memory_space<vmem>>, vector<1x1x32x32xbf16>
    %16 = vector.shape_cast %15 : vector<1x1x32x32xbf16> to vector<32x32xbf16>
    %cst_19 = arith.constant dense<0.000000e+00> : vector<24x32xf32>
    %17 = tpu.matmul %14, %16, %cst_19 {dimension_numbers = #tpu.dot_dimension_numbers<[1], [0], [0], [1], [0, 0, 1, 1], [], []>} : vector<24x32xbf16>, vector<32x32xbf16>, vector<24x32xf32> -> vector<24x32xf32>
    %18 = arith.addf %12, %17 : vector<24x32xf32>
    %c0_20 = arith.constant 0 : index
    %c0_21 = arith.constant 0 : index
    %c0_22 = arith.constant 0 : index
    %19 = vector.load %arg4[%c0_20, %c0_21, %c0_22] : memref<1x24x64xbf16, #tpu.memory_space<vmem>>, vector<1x24x32xbf16>
    %20 = vector.shape_cast %19 : vector<1x24x32xbf16> to vector<24x32xbf16>
    %c1_23 = arith.constant 1 : index
    %c0_24 = arith.constant 0 : index
    %c0_25 = arith.constant 0 : index
    %c0_26 = arith.constant 0 : index
    %21 = vector.load %arg8[%c1_23, %c0_24, %c0_25, %c0_26] : memref<3x3x32x32xbf16, #tpu.memory_space<vmem>>, vector<1x1x32x32xbf16>
    %22 = vector.shape_cast %21 : vector<1x1x32x32xbf16> to vector<32x32xbf16>
    %cst_27 = arith.constant dense<0.000000e+00> : vector<24x32xf32>
    %23 = tpu.matmul %20, %22, %cst_27 {dimension_numbers = #tpu.dot_dimension_numbers<[1], [0], [0], [1], [0, 0, 1, 1], [], []>} : vector<24x32xbf16>, vector<32x32xbf16>, vector<24x32xf32> -> vector<24x32xf32>
    %24 = arith.addf %18, %23 : vector<24x32xf32>
    %c0_28 = arith.constant 0 : index
    %c0_29 = arith.constant 0 : index
    %c32_30 = arith.constant 32 : index
    %25 = vector.load %arg4[%c0_28, %c0_29, %c32_30] : memref<1x24x64xbf16, #tpu.memory_space<vmem>>, vector<1x24x32xbf16>
    %26 = vector.shape_cast %25 : vector<1x24x32xbf16> to vector<24x32xbf16>
    %c1_31 = arith.constant 1 : index
    %c1_32 = arith.constant 1 : index
    %c0_33 = arith.constant 0 : index
    %c0_34 = arith.constant 0 : index
    %27 = vector.load %arg8[%c1_31, %c1_32, %c0_33, %c0_34] : memref<3x3x32x32xbf16, #tpu.memory_space<vmem>>, vector<1x1x32x32xbf16>
    %28 = vector.shape_cast %27 : vector<1x1x32x32xbf16> to vector<32x32xbf16>
    %cst_35 = arith.constant dense<0.000000e+00> : vector<24x32xf32>
    %29 = tpu.matmul %26, %28, %cst_35 {dimension_numbers = #tpu.dot_dimension_numbers<[1], [0], [0], [1], [0, 0, 1, 1], [], []>} : vector<24x32xbf16>, vector<32x32xbf16>, vector<24x32xf32> -> vector<24x32xf32>
    %30 = arith.addf %24, %29 : vector<24x32xf32>
    %c0_36 = arith.constant 0 : index
    %c0_37 = arith.constant 0 : index
    %c0_38 = arith.constant 0 : index
    %31 = vector.load %arg5[%c0_36, %c0_37, %c0_38] : memref<1x24x64xbf16, #tpu.memory_space<vmem>>, vector<1x24x32xbf16>
    %32 = vector.shape_cast %31 : vector<1x24x32xbf16> to vector<24x32xbf16>
    %c1_39 = arith.constant 1 : index
    %c2_40 = arith.constant 2 : index
    %c0_41 = arith.constant 0 : index
    %c0_42 = arith.constant 0 : index
    %33 = vector.load %arg8[%c1_39, %c2_40, %c0_41, %c0_42] : memref<3x3x32x32xbf16, #tpu.memory_space<vmem>>, vector<1x1x32x32xbf16>
    %34 = vector.shape_cast %33 : vector<1x1x32x32xbf16> to vector<32x32xbf16>
    %cst_43 = arith.constant dense<0.000000e+00> : vector<24x32xf32>
    %35 = tpu.matmul %32, %34, %cst_43 {dimension_numbers = #tpu.dot_dimension_numbers<[1], [0], [0], [1], [0, 0, 1, 1], [], []>} : vector<24x32xbf16>, vector<32x32xbf16>, vector<24x32xf32> -> vector<24x32xf32>
    %36 = arith.addf %30, %35 : vector<24x32xf32>
    %c0_44 = arith.constant 0 : index
    %c0_45 = arith.constant 0 : index
    %c0_46 = arith.constant 0 : index
    %37 = vector.load %arg6[%c0_44, %c0_45, %c0_46] : memref<1x24x64xbf16, #tpu.memory_space<vmem>>, vector<1x24x32xbf16>
    %38 = vector.shape_cast %37 : vector<1x24x32xbf16> to vector<24x32xbf16>
    %c2_47 = arith.constant 2 : index
    %c0_48 = arith.constant 0 : index
    %c0_49 = arith.constant 0 : index
    %c0_50 = arith.constant 0 : index
    %39 = vector.load %arg8[%c2_47, %c0_48, %c0_49, %c0_50] : memref<3x3x32x32xbf16, #tpu.memory_space<vmem>>, vector<1x1x32x32xbf16>
    %40 = vector.shape_cast %39 : vector<1x1x32x32xbf16> to vector<32x32xbf16>
    %cst_51 = arith.constant dense<0.000000e+00> : vector<24x32xf32>
    %41 = tpu.matmul %38, %40, %cst_51 {dimension_numbers = #tpu.dot_dimension_numbers<[1], [0], [0], [1], [0, 0, 1, 1], [], []>} : vector<24x32xbf16>, vector<32x32xbf16>, vector<24x32xf32> -> vector<24x32xf32>
    %42 = arith.addf %36, %41 : vector<24x32xf32>
    %c0_52 = arith.constant 0 : index
    %c0_53 = arith.constant 0 : index
    %c32_54 = arith.constant 32 : index
    %43 = vector.load %arg6[%c0_52, %c0_53, %c32_54] : memref<1x24x64xbf16, #tpu.memory_space<vmem>>, vector<1x24x32xbf16>
    %44 = vector.shape_cast %43 : vector<1x24x32xbf16> to vector<24x32xbf16>
    %c2_55 = arith.constant 2 : index
    %c1_56 = arith.constant 1 : index
    %c0_57 = arith.constant 0 : index
    %c0_58 = arith.constant 0 : index
    %45 = vector.load %arg8[%c2_55, %c1_56, %c0_57, %c0_58] : memref<3x3x32x32xbf16, #tpu.memory_space<vmem>>, vector<1x1x32x32xbf16>
    %46 = vector.shape_cast %45 : vector<1x1x32x32xbf16> to vector<32x32xbf16>
    %cst_59 = arith.constant dense<0.000000e+00> : vector<24x32xf32>
    %47 = tpu.matmul %44, %46, %cst_59 {dimension_numbers = #tpu.dot_dimension_numbers<[1], [0], [0], [1], [0, 0, 1, 1], [], []>} : vector<24x32xbf16>, vector<32x32xbf16>, vector<24x32xf32> -> vector<24x32xf32>
    %48 = arith.addf %42, %47 : vector<24x32xf32>
    %c0_60 = arith.constant 0 : index
    %c0_61 = arith.constant 0 : index
    %c0_62 = arith.constant 0 : index
    %49 = vector.load %arg7[%c0_60, %c0_61, %c0_62] : memref<1x24x64xbf16, #tpu.memory_space<vmem>>, vector<1x24x32xbf16>
    %50 = vector.shape_cast %49 : vector<1x24x32xbf16> to vector<24x32xbf16>
    %c2_63 = arith.constant 2 : index
    %c2_64 = arith.constant 2 : index
    %c0_65 = arith.constant 0 : index
    %c0_66 = arith.constant 0 : index
    %51 = vector.load %arg8[%c2_63, %c2_64, %c0_65, %c0_66] : memref<3x3x32x32xbf16, #tpu.memory_space<vmem>>, vector<1x1x32x32xbf16>
    %52 = vector.shape_cast %51 : vector<1x1x32x32xbf16> to vector<32x32xbf16>
    %cst_67 = arith.constant dense<0.000000e+00> : vector<24x32xf32>
    %53 = tpu.matmul %50, %52, %cst_67 {dimension_numbers = #tpu.dot_dimension_numbers<[1], [0], [0], [1], [0, 0, 1, 1], [], []>} : vector<24x32xbf16>, vector<32x32xbf16>, vector<24x32xf32> -> vector<24x32xf32>
    %54 = arith.addf %48, %53 : vector<24x32xf32>
    %c0_68 = arith.constant 0 : index
    %c0_69 = arith.constant 0 : index
    %55 = vector.load %arg9[%c0_68, %c0_69] : memref<1x32xf32, #tpu.memory_space<vmem>>, vector<1x32xf32>
    %56 = vector.broadcast %55 : vector<1x32xf32> to vector<24x32xf32>
    %57 = arith.addf %54, %56 : vector<24x32xf32>
    %cst_70 = arith.constant 0.000000e+00 : f32
    %58 = vector.broadcast %cst_70 : f32 to vector<24x32xf32>
    %59 = arith.maximumf %57, %58 : vector<24x32xf32>
    %60 = arith.truncf %59 : vector<24x32xf32> to vector<24x32xbf16>
    %c0_71 = arith.constant 0 : index
    %c0_72 = arith.constant 0 : index
    %c0_73 = arith.constant 0 : index
    %61 = vector.load %arg10[%c0_71, %c0_72, %c0_73] : memref<1x24x32xbf16, #tpu.memory_space<vmem>>, vector<1x24x32xbf16>
    %62 = vector.shape_cast %61 : vector<1x24x32xbf16> to vector<24x32xbf16>
    %63 = vector.shape_cast %60 : vector<24x32xbf16> to vector<1x24x32xbf16>
    tpu.vector_store %arg10[%c0_71, %c0_72, %c0_73], %63 {strides = array<i32>} : memref<1x24x32xbf16, #tpu.memory_space<vmem>>, vector<1x24x32xbf16>,
    return
  }
  func.func @transform_0(%arg0: i32, %arg1: i32) -> (i32, i32, i32) {
    %c0_i32 = arith.constant 0 : i32
    %c0_i32_0 = arith.constant 0 : i32
    return %arg0, %arg1, %c0_i32 : i32, i32, i32
  }
  func.func @transform_1(%arg0: i32, %arg1: i32) -> (i32, i32, i32) {
    %c0_i32 = arith.constant 0 : i32
    %c0_i32_0 = arith.constant 0 : i32
    return %arg0, %arg1, %c0_i32 : i32, i32, i32
  }
  func.func @transform_2(%arg0: i32, %arg1: i32) -> (i32, i32, i32) {
    %c0_i32 = arith.constant 0 : i32
    %c0_i32_0 = arith.constant 0 : i32
    return %arg0, %arg1, %c0_i32 : i32, i32, i32
  }
  func.func @transform_3(%arg0: i32, %arg1: i32) -> (i32, i32, i32) {
    %c0_i32 = arith.constant 0 : i32
    %c0_i32_0 = arith.constant 0 : i32
    return %arg0, %arg1, %c0_i32 : i32, i32, i32
  }
  func.func @transform_4(%arg0: i32, %arg1: i32) -> (i32, i32, i32) {
    %c0_i32 = arith.constant 0 : i32
    %c0_i32_0 = arith.constant 0 : i32
    return %arg0, %arg1, %c0_i32 : i32, i32, i32
  }
  func.func @transform_5(%arg0: i32, %arg1: i32) -> (i32, i32, i32) {
    %c0_i32 = arith.constant 0 : i32
    %c0_i32_0 = arith.constant 0 : i32
    return %arg0, %arg1, %c0_i32 : i32, i32, i32
  }
  func.func @transform_6(%arg0: i32, %arg1: i32) -> (i32, i32, i32, i32) {
    %c0_i32 = arith.constant 0 : i32
    %c0_i32_0 = arith.constant 0 : i32
    %c0_i32_1 = arith.constant 0 : i32
    %c0_i32_2 = arith.constant 0 : i32
    %c0_i32_3 = arith.constant 0 : i32
    return %c0_i32, %c0_i32_0, %c0_i32_1, %c0_i32_2 : i32, i32, i32, i32
  }
  func.func @transform_7(%arg0: i32, %arg1: i32) -> (i32, i32) {
    %c0_i32 = arith.constant 0 : i32
    %c0_i32_0 = arith.constant 0 : i32
    %c0_i32_1 = arith.constant 0 : i32
    return %c0_i32, %c0_i32_0 : i32, i32
  }
  func.func @transform_8(%arg0: i32, %arg1: i32) -> (i32, i32, i32) {
    %c0_i32 = arith.constant 0 : i32
    %c0_i32_0 = arith.constant 0 : i32
    return %arg0, %arg1, %c0_i32 : i32, i32, i32
  }
}

module attributes {stable_mosaic.version = 11 : i64} {
  func.func @_head_kernel(%arg0: i32, %arg1: i32, %arg2: memref<1x4x96xbf16, #tpu.memory_space<vmem>>, %arg3: memref<1x4x64xbf16, #tpu.memory_space<vmem>>, %arg4: memref<96x64xbf16, #tpu.memory_space<vmem>>, %arg5: memref<1x64xf32, #tpu.memory_space<vmem>>, %arg6: memref<64x32xbf16, #tpu.memory_space<vmem>>, %arg7: memref<64x32xbf16, #tpu.memory_space<vmem>>, %arg8: memref<1x32xf32, #tpu.memory_space<vmem>>, %arg9: memref<4x32xf32, #tpu.memory_space<vmem>>, %arg10: memref<1x4x32xf32, #tpu.memory_space<vmem>>) attributes {dimension_semantics = [#tpu.dimension_semantics<parallel>, #tpu.dimension_semantics<parallel>], iteration_bounds = array<i64: 2, 1>, scalar_prefetch = 0 : i64, scratch_operands = 0 : i64, tpu.core_type = #tpu.core_type<tc>, window_params = [{transform_indices = @transform_0, window_bounds = array<i64: 1, 4, 96>}, {transform_indices = @transform_1, window_bounds = array<i64: 1, 4, 64>}, {pipeline_mode = #tpu.pipeline_mode<synchronous>, transform_indices = @transform_2, window_bounds = array<i64: 96, 64>}, {pipeline_mode = #tpu.pipeline_mode<synchronous>, transform_indices = @transform_3, window_bounds = array<i64: 1, 64>}, {pipeline_mode = #tpu.pipeline_mode<synchronous>, transform_indices = @transform_4, window_bounds = array<i64: 64, 32>}, {pipeline_mode = #tpu.pipeline_mode<synchronous>, transform_indices = @transform_5, window_bounds = array<i64: 64, 32>}, {pipeline_mode = #tpu.pipeline_mode<synchronous>, transform_indices = @transform_6, window_bounds = array<i64: 1, 32>}, {transform_indices = @transform_7, window_bounds = array<i64: 4, 32>}, {transform_indices = @transform_8, window_bounds = array<i64: 1, 4, 32>}]} {
    %c0 = arith.constant 0 : index
    %c0_0 = arith.constant 0 : index
    %c0_1 = arith.constant 0 : index
    %0 = vector.load %arg2[%c0, %c0_0, %c0_1] : memref<1x4x96xbf16, #tpu.memory_space<vmem>>, vector<1x4x96xbf16>
    %1 = vector.shape_cast %0 : vector<1x4x96xbf16> to vector<4x96xbf16>
    %c0_2 = arith.constant 0 : index
    %c0_3 = arith.constant 0 : index
    %2 = vector.load %arg4[%c0_2, %c0_3] : memref<96x64xbf16, #tpu.memory_space<vmem>>, vector<96x64xbf16>
    %cst = arith.constant dense<0.000000e+00> : vector<4x64xf32>
    %3 = tpu.matmul %1, %2, %cst {dimension_numbers = #tpu.dot_dimension_numbers<[1], [0], [0], [1], [0, 0, 1, 1], [], []>} : vector<4x96xbf16>, vector<96x64xbf16>, vector<4x64xf32> -> vector<4x64xf32>
    %c0_4 = arith.constant 0 : index
    %c0_5 = arith.constant 0 : index
    %4 = vector.load %arg5[%c0_4, %c0_5] : memref<1x64xf32, #tpu.memory_space<vmem>>, vector<1x64xf32>
    %5 = vector.broadcast %4 : vector<1x64xf32> to vector<4x64xf32>
    %6 = arith.addf %3, %5 : vector<4x64xf32>
    %7 = arith.truncf %6 : vector<4x64xf32> to vector<4x64xbf16>
    %c0_6 = arith.constant 0 : index
    %c0_7 = arith.constant 0 : index
    %8 = vector.load %arg6[%c0_6, %c0_7] : memref<64x32xbf16, #tpu.memory_space<vmem>>, vector<64x32xbf16>
    %cst_8 = arith.constant dense<0.000000e+00> : vector<4x32xf32>
    %9 = tpu.matmul %7, %8, %cst_8 {dimension_numbers = #tpu.dot_dimension_numbers<[1], [0], [0], [1], [0, 0, 1, 1], [], []>} : vector<4x64xbf16>, vector<64x32xbf16>, vector<4x32xf32> -> vector<4x32xf32>
    %c0_9 = arith.constant 0 : index
    %c0_10 = arith.constant 0 : index
    %c0_11 = arith.constant 0 : index
    %10 = vector.load %arg3[%c0_9, %c0_10, %c0_11] : memref<1x4x64xbf16, #tpu.memory_space<vmem>>, vector<1x4x64xbf16>
    %11 = vector.shape_cast %10 : vector<1x4x64xbf16> to vector<4x64xbf16>
    %c0_12 = arith.constant 0 : index
    %c0_13 = arith.constant 0 : index
    %12 = vector.load %arg7[%c0_12, %c0_13] : memref<64x32xbf16, #tpu.memory_space<vmem>>, vector<64x32xbf16>
    %cst_14 = arith.constant dense<0.000000e+00> : vector<4x32xf32>
    %13 = tpu.matmul %11, %12, %cst_14 {dimension_numbers = #tpu.dot_dimension_numbers<[1], [0], [0], [1], [0, 0, 1, 1], [], []>} : vector<4x64xbf16>, vector<64x32xbf16>, vector<4x32xf32> -> vector<4x32xf32>
    %14 = arith.addf %9, %13 : vector<4x32xf32>
    %c0_15 = arith.constant 0 : index
    %c0_16 = arith.constant 0 : index
    %15 = vector.load %arg8[%c0_15, %c0_16] : memref<1x32xf32, #tpu.memory_space<vmem>>, vector<1x32xf32>
    %16 = vector.broadcast %15 : vector<1x32xf32> to vector<4x32xf32>
    %17 = arith.addf %14, %16 : vector<4x32xf32>
    %cst_17 = arith.constant 5.65685415 : f32
    %18 = vector.broadcast %cst_17 : f32 to vector<4x32xf32>
    %19 = arith.mulf %17, %18 : vector<4x32xf32>
    %c0_18 = arith.constant 0 : index
    %c0_19 = arith.constant 0 : index
    %20 = vector.load %arg9[%c0_18, %c0_19] : memref<4x32xf32, #tpu.memory_space<vmem>>, vector<4x32xf32>
    %21 = arith.addf %19, %20 : vector<4x32xf32>
    %c0_20 = arith.constant 0 : index
    %c0_21 = arith.constant 0 : index
    %c0_22 = arith.constant 0 : index
    %22 = vector.load %arg10[%c0_20, %c0_21, %c0_22] : memref<1x4x32xf32, #tpu.memory_space<vmem>>, vector<1x4x32xf32>
    %23 = vector.shape_cast %22 : vector<1x4x32xf32> to vector<4x32xf32>
    %24 = vector.shape_cast %21 : vector<4x32xf32> to vector<1x4x32xf32>
    tpu.vector_store %arg10[%c0_20, %c0_21, %c0_22], %24 {strides = array<i32>} : memref<1x4x32xf32, #tpu.memory_space<vmem>>, vector<1x4x32xf32>,
    return
  }
  func.func @transform_0(%arg0: i32, %arg1: i32) -> (i32, i32, i32) {
    %c0_i32 = arith.constant 0 : i32
    %c0_i32_0 = arith.constant 0 : i32
    return %arg0, %arg1, %c0_i32 : i32, i32, i32
  }
  func.func @transform_1(%arg0: i32, %arg1: i32) -> (i32, i32, i32) {
    %c0_i32 = arith.constant 0 : i32
    %c0_i32_0 = arith.constant 0 : i32
    return %arg0, %arg1, %c0_i32 : i32, i32, i32
  }
  func.func @transform_2(%arg0: i32, %arg1: i32) -> (i32, i32) {
    %c0_i32 = arith.constant 0 : i32
    %c0_i32_0 = arith.constant 0 : i32
    %c0_i32_1 = arith.constant 0 : i32
    return %c0_i32, %c0_i32_0 : i32, i32
  }
  func.func @transform_3(%arg0: i32, %arg1: i32) -> (i32, i32) {
    %c0_i32 = arith.constant 0 : i32
    %c0_i32_0 = arith.constant 0 : i32
    %c0_i32_1 = arith.constant 0 : i32
    return %c0_i32, %c0_i32_0 : i32, i32
  }
  func.func @transform_4(%arg0: i32, %arg1: i32) -> (i32, i32) {
    %c0_i32 = arith.constant 0 : i32
    %c0_i32_0 = arith.constant 0 : i32
    %c0_i32_1 = arith.constant 0 : i32
    return %c0_i32, %c0_i32_0 : i32, i32
  }
  func.func @transform_5(%arg0: i32, %arg1: i32) -> (i32, i32) {
    %c0_i32 = arith.constant 0 : i32
    %c0_i32_0 = arith.constant 0 : i32
    %c0_i32_1 = arith.constant 0 : i32
    return %c0_i32, %c0_i32_0 : i32, i32
  }
  func.func @transform_6(%arg0: i32, %arg1: i32) -> (i32, i32) {
    %c0_i32 = arith.constant 0 : i32
    %c0_i32_0 = arith.constant 0 : i32
    %c0_i32_1 = arith.constant 0 : i32
    return %c0_i32, %c0_i32_0 : i32, i32
  }
  func.func @transform_7(%arg0: i32, %arg1: i32) -> (i32, i32) {
    %c0_i32 = arith.constant 0 : i32
    %c0_i32_0 = arith.constant 0 : i32
    return %arg1, %c0_i32 : i32, i32
  }
  func.func @transform_8(%arg0: i32, %arg1: i32) -> (i32, i32, i32) {
    %c0_i32 = arith.constant 0 : i32
    %c0_i32_0 = arith.constant 0 : i32
    return %arg0, %arg1, %c0_i32 : i32, i32, i32
  }
}

</mosaic_0001>

<bundles_post_ra>
// kernel: conv2d_av_subsampling.3
= control target key start
LH: loop header
LB: loop body
LE: loop exit
PB: predicated region body
PF: predicated region fallthrough
CT: control target
= control target key end

     0   :  { %s1649_s27 = smov 0   ;;  %s1651_s28 = smov 0   ;;  %s2029_s0 = inlined_call_operand.vmem [shape: bf16[2,56,2], index: 0, kind: input, shape index: {}]   ;;  %s2030_s1 = inlined_call_operand.vmem [shape: bf16[2,56,2], index: 1, kind: input, shape index: {}]   ;;  %s2031_s2 = inlined_call_operand.vmem [shape: bf16[2,56,2], index: 2, kind: input, shape index: {}]   ;;  %s2032_s3 = inlined_call_operand.vmem [shape: bf16[2,56,2], index: 3, kind: input, shape index: {}]   ;;  %s2033_s4 = inlined_call_operand.vmem [shape: bf16[2,56,2], index: 4, kind: input, shape index: {}]   ;;  %s2034_s5 = inlined_call_operand.vmem [shape: bf16[2,56,2], index: 5, kind: input, shape index: {}]   ;;  %s2035_s6 = inlined_call_operand.vmem [shape: bf16[3,3,1,32], index: 6, kind: input, shape index: {}]   ;;  %s2036_s7 = inlined_call_operand.vmem [shape: f32[1,32], index: 7, kind: input, shape index: {}]   ;;  %s2037_s8 = inlined_call_operand.vmem [shape: bf16[2,56,32], index: 8, kind: output, shape index: {}]  }
   0x1   :  { %s1653_s29 = smov 0  }
   0x2 LB: > { %s30_s30 = sadd.s32 1, %s1596_s28  ;;  %p1278_p0 = scmp.ge.s32.totalorder %s1600_s29, 1  ;;  %s1600_s29 = sphi %s1653_s29, %s18_s29   ;;  %s1596_s28 = sphi %s1651_s28, %s2039_s28   ;;  %s1592_s27 = sphi %s1649_s27, %s2038_s27  }
   0x3   : > { %p32_p1 = scmp.ge.s32.totalorder %s30_s30, 2  ;;  %p368_p2 = scmp.lt.s32.totalorder %s1600_s29, 3 }
   0x5   : > { %s2041_s30 = smov (%p32_p1, %s30_s30), 0  ;;  %p369_p3 = pnand %p1278_p0, %p368_p2 }
   0x6   : > { %p456_p4 = scmp.lt.s32.totalorder (!%p369_p3), %s1592_s27, 1 }
   0x7   : > { %372 = sbr.rel (%p369_p3) target bundleno = 244 (0xf4), region = 52 }
   0xc   : > { %v1602_v0 = vmov 1   ;;  %v1603_v1 = vmov 0   ;;  %s2043_s27 = smov (!%p456_p4, %s1592_s27), 1  ;;  %vm1089_vm0 = vcmask 257024  }
   0xd   : > { %1429 = vset.pattern.permute.xlu0 %v1602_v0  ;;  %1418 = vset.pattern.permute.xlu2 %v1602_v0  ;;  %s1670_s9 = smul.u32 28, %s2043_s27 }
   0xe   : > { %1407 = vset.pattern.permute.xlu1 %v1603_v1 }
   0xf   : > { %s463_s12 = scalar_lea.vmem %s2029_s0, %s1670_s9  ;;  %s1680_s15 = scalar_lea.vmem %s2031_s2, %s1670_s9 }
  0x10   : > { %v1369_v2 = vld [vmem:[%s463_s12 + $0x10] sm:$0xff]   ;;  %v1297_v3 = vld [vmem:[%s463_s12] sm:$0xff]   ;;  %s1686_s18 = scalar_lea.vmem %s2030_s1, %s1670_s9  ;;  %v1689_v8 = vld [vmem:[%s1680_s15 + $0x8] sm:$0xff]   ;;  %s1701_s21 = scalar_lea.vmem %s2033_s4, %s1670_s9 }
  0x11   : > { %v1306_v4 = vunpack.c.l.bf16 %v1369_v2  ;;  %v1307_v5 = vunpack.c.h.bf16 %v1369_v2  ;;  %v1298_v6 = vunpack.c.l.bf16 %v1297_v3  ;;  %v1299_v7 = vunpack.c.h.bf16 %v1297_v3  ;;  %v1692_v9 = vld [vmem:[%s1680_s15 + $0x10] sm:$0xff]   ;;  %v531_v10 = vld [vmem:[%s463_s12 + $0x18] sm:$0xf]  ;;  %v1309_v11 = vld [vmem:[%s1686_s18] sm:$0xff]   ;;  %s1721_s24 = scalar_lea.vmem %s2032_s3, %s1670_s9  ;;  %s1732_s27 = scalar_lea.vmem %s2034_s5, %s1670_s9 }
  0x12   : > { %v1368_v14 = vld [vmem:[%s463_s12 + $0x8] sm:$0xff]   ;;  %v1327_v15 = vunpack.c.h.bf16 %v1689_v8  ;;  %v1330_v16 = vunpack.c.l.bf16 %v1692_v9  ;;  %v539_v17 = vunpack.c.l.bf16 %v531_v10  ;;  %v1310_v18 = vunpack.c.l.bf16 %v1309_v11  ;;  %v1321_v25 = vld [vmem:[%s1680_s15] sm:$0xff]   ;;  %v1371_v35 = vld [vmem:[%s1686_s18 + $0x10] sm:$0xff]   ;;  %s1975_s14 = scalar_lea.vmem %s2037_s8, %s1670_s9 }
  0x13   : > { %v1430_v12 = vpack.i.bf16 %v1307_v5, %v1306_v4  ;;  %v1419_v13 = vpack.i.bf16 %v1299_v7, %v1298_v6  ;;  %v1302_v19 = vunpack.c.l.bf16 %v1368_v14  ;;  %v1303_v20 = vunpack.c.h.bf16 %v1368_v14  ;;  %v1376_v24 = vld [vmem:[%s1701_s21 + $0x8] sm:$0xff]   ;;  %v643_v36 = vld [vmem:[%s1686_s18 + $0x18] sm:$0xf]  ;;  %v1333_v48 = vld [vmem:[%s1721_s24] sm:$0xff]  }
  0x14   : > { %v1479_v21 = vpack.i.bf16 %v1330_v16, %v1327_v15  ;;  %v1413_v22 = vpack.i.bf16 %v1310_v18, %v539_v17  ;;  %v1370_v26 = vld [vmem:[%s1686_s18 + $0x8] sm:$0xff]   ;;  %v1350_v27 = vunpack.c.l.bf16 %v1376_v24  ;;  %v1351_v28 = vunpack.c.h.bf16 %v1376_v24  ;;  %v710_v47 = vld [vmem:[%s1680_s15 + $0x18] sm:$0xf]  ;;  %v1345_v54 = vld [vmem:[%s1701_s21] sm:$0xff]  }
  0x15   : > { %1431 = vperm.xlu0 %1429, %v1430_v12   ;;  %1409 = vperm.xlu1 %1407, %v1430_v12   ;;  %v1424_v23 = vpack.i.bf16 %v1303_v20, %v1302_v19  ;;  %v1322_v29 = vunpack.c.l.bf16 %v1321_v25  ;;  %v1311_v30 = vunpack.c.h.bf16 %v1309_v11  ;;  %v1314_v31 = vunpack.c.l.bf16 %v1370_v26  ;;  %v1374_v58 = vld [vmem:[%s1721_s24 + $0x8] sm:$0xff]   ;;  %v1379_v62 = vld [vmem:[%s1732_s27 + $0x10] sm:$0xff]   ;;  %v1003_v63 = vld [vmem:[%s1732_s27 + $0x18] sm:$0xf] }
  0x16   : > { %1420 = vperm.xlu2 %1418, %v1419_v13   ;;  %v1706_v32 = vpack.i.bf16 %v1351_v28, %v1350_v27  ;;  %v1319_v37 = vunpack.c.h.bf16 %v1371_v35  ;;  %v652_v38 = vunpack.c.l.bf16 %v643_v36  ;;  %v1315_v39 = vunpack.c.h.bf16 %v1370_v26  ;;  %v1375_v4 = vld [vmem:[%s1721_s24 + $0x10] sm:$0xff]   ;;  %v823_v5 = vld [vmem:[%s1721_s24 + $0x18] sm:$0xf]  ;;  %v1357_v20 = vld [vmem:[%s1732_s27] sm:$0xff]  }
  0x17   : > { %v1436_v33 = vpack.i.bf16 %v1322_v29, %v539_v17  ;;  %v1442_v34 = vpack.i.bf16 %v1314_v31, %v1311_v30  ;;  %v1318_v40 = vunpack.c.l.bf16 %v1371_v35  ;;  %v1331_v43 = vunpack.c.h.bf16 %v1692_v9  ;;  %v890_v19 = vld [vmem:[%s1701_s21 + $0x18] sm:$0xf]  ;;  %v1378_v24 = vld [vmem:[%s1732_s27 + $0x8] sm:$0xff]   ;;  %v1287_v36 = vld [vmem:[%s2035_s6 + $0x2] sm:$0x1] }
  0x18   : > { %v1453_v41 = vpack.i.bf16 %v652_v38, %v1319_v37  ;;  %v1326_v44 = vunpack.c.l.bf16 %v1689_v8  ;;  %v1323_v49 = vunpack.c.h.bf16 %v1321_v25  ;;  %v719_v50 = vunpack.c.l.bf16 %v710_v47 }
  0x19   : > { %v1448_v42 = vpack.i.bf16 %v1318_v40, %v1315_v39  ;;  %v1463_v45 = vpack.i.bf16 %v1331_v43, %v1330_v16  ;;  %v1334_v51 = vunpack.c.l.bf16 %v1333_v48  ;;  %v1346_v56 = vunpack.c.l.bf16 %v1345_v54 }
  0x1a   : > { %v1458_v46 = vpack.i.bf16 %v1327_v15, %v1326_v44  ;;  %v1544_v52 = vpack.i.bf16 %v1323_v49, %v1322_v29  ;;  %v1474_v55 = vpack.i.bf16 %v1326_v44, %v1323_v49  ;;  %v1347_v57 = vunpack.c.h.bf16 %v1345_v54  ;;  %v1377_v15 = vld [vmem:[%s1701_s21 + $0x10] sm:$0xff]  }
  0x1b   : > { %v1468_v53 = vpack.i.bf16 %v1334_v51, %v719_v50  ;;  %v1335_v59 = vunpack.c.h.bf16 %v1333_v48  ;;  %v1338_v60 = vunpack.c.l.bf16 %v1374_v58  ;;  %v1485_v2 = vpack.i.bf16 %v719_v50, %v1331_v43 }
  0x1c   : > { %v1549_v61 = vpack.i.bf16 %v1347_v57, %v1346_v56  ;;  %v1367_v6 = vunpack.c.h.bf16 %v1379_v62  ;;  %v1012_v7 = vunpack.c.l.bf16 %v1003_v63  ;;  %v1343_v8 = vunpack.c.h.bf16 %v1375_v4 }
  0x1d   : > { %1480 = vperm.xlu0 %1429, %v1479_v21   ;;  %1414 = vperm.xlu1 %1407, %v1413_v22   ;;  %v1491_v3 = vpack.i.bf16 %v1338_v60, %v1335_v59  ;;  %v832_v9 = vunpack.c.l.bf16 %v823_v5  ;;  %v1339_v10 = vunpack.c.h.bf16 %v1374_v58  ;;  %v1342_v11 = vunpack.c.l.bf16 %v1375_v4 }
  0x1e   : > { %1425 = vperm.xlu2 %1418, %v1424_v23   ;;  %v1572_v12 = vpack.i.bf16 %v1012_v7, %v1367_v6  ;;  %v1354_v16 = vunpack.c.l.bf16 %v1377_v15  ;;  %v1355_v17 = vunpack.c.h.bf16 %v1377_v15  ;;  %v899_v21 = vunpack.c.l.bf16 %v890_v19 }
  0x1f   : > { %v1497_v14 = vpack.i.bf16 %v1342_v11, %v1339_v10  ;;  %v1358_v22 = vunpack.c.l.bf16 %v1357_v20  ;;  %v1359_v25 = vunpack.c.h.bf16 %v1357_v20  ;;  %v1362_v26 = vunpack.c.l.bf16 %v1378_v24  ;;  %v1288_v20 = vld [vmem:[%s2035_s6 + $0x3] sm:$0x1] }
  0x20   : > { %v1512_v18 = vpack.i.bf16 %v1355_v17, %v1354_v16  ;;  %v1363_v27 = vunpack.c.h.bf16 %v1378_v24  ;;  %v1366_v28 = vunpack.c.l.bf16 %v1379_v62 }
  0x21   : > { %v1561_v29 = vpack.i.bf16 %v1362_v26, %v1359_v25 }
  0x22   : > { %v1567_v30 = vpack.i.bf16 %v1366_v28, %v1363_v27  ;;  %v1292_v28 = vld [vmem:[%s2035_s6 + $0x7] sm:$0x1] }
  0x25   : > { %1529 = vperm.xlu0 %1429, %v1706_v32   ;;  %1435 = vset.pattern.permute.xlu1 %v1602_v0 }
  0x26   : > { %1441 = vset.pattern.permute.xlu2 %v1603_v1  ;;  %1437 = vperm.xlu1 %1435, %v1436_v33   ;;  %v532_v33 = vld [vmem:[%s2035_s6] sm:$0x1] }
  0x27   : > { %1443 = vperm.xlu2 %1441, %v1442_v34   ;;  %v540_v37 = vunpack.c.l.bf16 %v532_v33 }
  0x29   : > { %v1765_v39 = vperm.slane %v540_v37, 0 }
  0x2d   : > { %1533 = vset.pattern.permute.xlu0 %v1603_v1 }
  0x2e   : > { %1447 = vset.pattern.permute.xlu1 %v1603_v1  ;;  %1535 = vperm.xlu0 %1533, %v1419_v13   ;;  %v1502_v13 = vpack.i.bf16 %v832_v9, %v1343_v8 }
  0x2f   : > { %1454 = vperm.xlu2 %1441, %v1453_v41   ;;  %1449 = vperm.xlu1 %1447, %v1448_v42  }
  0x36   : > { %1540 = vperm.xlu0 %1533, %v1424_v23   ;;  %v1517_v23 = vpack.i.bf16 %v1358_v22, %v899_v21 }
  0x37   : > { %1464 = vperm.xlu2 %1441, %v1463_v45   ;;  %1459 = vperm.xlu1 %1447, %v1458_v46  }
  0x3e   : > { %1545 = vperm.xlu0 %1533, %v1544_v52  }
  0x3f   : > { %1473 = vset.pattern.permute.xlu2 %v1602_v0  ;;  %1469 = vperm.xlu1 %1447, %v1468_v53  }
  0x40   : > { %1475 = vperm.xlu2 %1473, %v1474_v55  }
  0x46   : > { %1550 = vperm.xlu0 %1533, %v1549_v61  }
  0x47   : > { %1484 = vset.pattern.permute.xlu1 %v1602_v0 }
  0x48   : > { %1490 = vset.pattern.permute.xlu2 %v1603_v1  ;;  %1486 = vperm.xlu1 %1484, %v1485_v2  }
  0x49   : > { %1492 = vperm.xlu2 %1490, %v1491_v3  }
  0x4e   : > { %1573 = vperm.xlu0 %1533, %v1572_v12  }
  0x50   : > { %1496 = vset.pattern.permute.xlu1 %v1603_v1 }
  0x51   : > { %1503 = vperm.xlu2 %1490, %v1502_v13   ;;  %1498 = vperm.xlu1 %1496, %v1497_v14  }
  0x59   : > { %1513 = vperm.xlu2 %1490, %v1512_v18   ;;  %1508 = vperm.xlu1 %1496, %v1706_v32  }
  0x61   : > { %1522 = vset.pattern.permute.xlu2 %v1602_v0  ;;  %1518 = vperm.xlu1 %1496, %v1517_v23   ;;  %v720_v23 = vunpack.c.l.bf16 %v1288_v20 }
  0x62   : > { %1524 = vperm.xlu2 %1522, %v1549_v61  }
  0x69   : > { %1554 = vset.pattern.permute.xlu1 %v1602_v0  ;;  %v1286_v0 = vld [vmem:[%s2035_s6 + $0x1] sm:$0x1] }
  0x6a   : > { %1556 = vperm.xlu1 %1554, %v1512_v18   ;;  %979 = vperm.xlu2 %1522, %v899_v21   ;;  %v593_v35 = vunpack.c.l.bf16 %v1286_v0  ;;  %v1289_v21 = vld [vmem:[%s2035_s6 + $0x4] sm:$0x1] }
  0x6b   : > { %v773_v24 = vunpack.c.l.bf16 %v1289_v21 }
  0x6c   : > { %v1763_v38 = vperm.slane %v593_v35, 0 }
  0x6d   : > { %v1840_v35 = vperm.slane %v773_v24, 0 }
  0x70   : > { %v1748_v31 = vpop.permute.xlu2 %1420 }
  0x71   : > { %v1423_v58 = vunpack.i.h.bf16 %v1748_v31  ;;  %v1422_v22 = vunpack.i.l.bf16 %v1748_v31 }
  0x72   : > { %1560 = vset.pattern.permute.xlu1 %v1603_v1  ;;  %1566 = vset.pattern.permute.xlu2 %v1603_v1  ;;  %v653_v1 = vunpack.c.l.bf16 %v1287_v36  ;;  %v953_v36 = vunpack.c.l.bf16 %v1292_v28 }
  0x73   : > { %1562 = vperm.xlu1 %1560, %v1561_v29   ;;  %1568 = vperm.xlu2 %1566, %v1567_v30   ;;  %v624_v63 = vmul.f32 %v1423_v58, %v1763_v38  ;;  %v1290_v29 = vld [vmem:[%s2035_s6 + $0x5] sm:$0x1]  ;;  %v623_v31 = vmul.f32 %v1422_v22, %v1763_v38 }
  0x74   : > { %v1773_v44 = vperm.slane %v653_v1, 0  ;;  %v833_v37 = vunpack.c.l.bf16 %v1290_v29 }
  0x78   : > { %v1752_v32 = vpop.permute.xlu2 %1425 }
  0x79   : > { %v1427_v6 = vunpack.i.l.bf16 %v1752_v32  ;;  %v1428_v30 = vunpack.i.h.bf16 %v1752_v32 }
  0x7b   : > { %v625_v12 = vmul.f32 %v1427_v6, %v1763_v38 }
  0x81   : > { %v1444_v34 = vpop.permute.xlu2 %1443 }
  0x82   : > { %v1445_v60 = vunpack.i.l.bf16 %v1444_v34  ;;  %v1446_v9 = vunpack.i.h.bf16 %v1444_v34  ;;  %v1838_v34 = vperm.slane %v720_v23, 0 }
  0x84   : > { %v691_v4 = vmul.f32 %v1445_v60, %v1773_v44  ;;  %v692_v15 = vmul.f32 %v1446_v9, %v1773_v44 }
  0x87   : > { %v1767_v40 = vpop.permute.xlu0 %1431  ;;  %v1769_v41 = vpop.permute.xlu1 %1409 }
  0x88   : > { %v1434_v42 = vunpack.i.h.bf16 %v1767_v40  ;;  %v1412_v43 = vunpack.i.h.bf16 %v1769_v41  ;;  %v1433_v26 = vunpack.i.l.bf16 %v1767_v40  ;;  %v1411_v27 = vunpack.i.l.bf16 %v1769_v41 }
  0x89   : > { %v1775_v45 = vpop.permute.xlu2 %1454 }
  0x8a   : > { %v628_v46 = vmul.f32 %v1434_v42, %v1763_v38  ;;  %v582_v47 = vmul.f32 %v1412_v43, %v1765_v39  ;;  %v1456_v48 = vunpack.i.l.bf16 %v1775_v45  ;;  %v627_v42 = vmul.f32 %v1433_v26, %v1763_v38 }
  0x8b   : > { %v581_v32 = vmul.f32 %v1411_v27, %v1765_v39  ;;  %v1457_v43 = vunpack.i.h.bf16 %v1775_v45  ;;  %v1861_v45 = vperm.slane %v833_v37, 0 }
  0x8c   : > { %v635_v49 = vadd.f32 %v628_v46, %v582_v47  ;;  %v695_v50 = vmul.f32 %v1456_v48, %v1773_v44  ;;  %v626_v47 = vmul.f32 %v1428_v30, %v1763_v38 }
  0x8d   : > { %v696_v6 = vmul.f32 %v1457_v43, %v1773_v44 }
  0x8e   : > { %v1781_v51 = vadd.f32 %v695_v50, %v635_v49 }
  0x8f   : > { %v1783_v52 = vpop.permute.xlu1 %1414  ;;  %v1785_v53 = vpop.permute.xlu0 %1480 }
  0x90   : > { %v1417_v46 = vunpack.i.h.bf16 %v1783_v52  ;;  %v1416_v58 = vunpack.i.l.bf16 %v1783_v52  ;;  %v1482_v60 = vunpack.i.l.bf16 %v1785_v53 }
  0x91   : > { %v1787_v54 = vpop.permute.xlu2 %1464 }
  0x92   : > { %v1466_v52 = vunpack.i.l.bf16 %v1787_v54  ;;  %v806_v20 = vmul.f32 %v1482_v60, %v1840_v35 }
  0x94   : > { %v761_v26 = vmul.f32 %v1466_v52, %v1838_v34 }
  0x97   : > { %v1789_v55 = vpop.permute.xlu0 %1529 }
  0x98   : > { %v1791_v56 = vpop.permute.xlu1 %1437 }
  0x99   : > { %v1439_v48 = vunpack.i.l.bf16 %v1791_v56  ;;  %v1440_v22 = vunpack.i.h.bf16 %v1791_v56 }
  0x9a   : > { %v1793_v57 = vpop.permute.xlu2 %1475 }
  0x9b   : > { %v629_v9 = vmul.f32 %v1439_v48, %v1763_v38  ;;  %v1532_v38 = vunpack.i.h.bf16 %v1789_v55  ;;  %v1478_v27 = vunpack.i.h.bf16 %v1793_v57  ;;  %v1477_v28 = vunpack.i.l.bf16 %v1793_v57 }
  0x9c   : > { %v803_v57 = vmul.f32 %v1440_v22, %v1840_v35 }
  0xa0   : > { %v1536_v59 = vpop.permute.xlu0 %1535 }
  0xa1   : > { %v1538_v61 = vunpack.i.h.bf16 %v1536_v59  ;;  %v1796_v62 = vpop.permute.xlu1 %1449  ;;  %v1537_v0 = vunpack.i.l.bf16 %v1536_v59  ;;  %v1483_v59 = vunpack.i.h.bf16 %v1785_v53 }
  0xa2   : > { %v1451_v50 = vunpack.i.l.bf16 %v1796_v62 }
  0xa3   : > { %v578_v2 = vmul.f32 %v1538_v61, %v1765_v39  ;;  %v1800_v3 = vpop.permute.xlu2 %1492  ;;  %v577_v49 = vmul.f32 %v1537_v0, %v1765_v39  ;;  %v1467_v61 = vunpack.i.h.bf16 %v1787_v54 }
  0xa5   : > { %v631_v5 = vadd.f32 %v624_v63, %v578_v2  ;;  %v1859_v63 = vperm.slane %v953_v36, 0  ;;  %v630_v53 = vadd.f32 %v623_v31, %v577_v49  ;;  %v762_v54 = vmul.f32 %v1467_v61, %v1838_v34 }
  0xa7   : > { %v1804_v7 = vadd.f32 %v691_v4, %v631_v5  ;;  %v1864_v5 = vadd.f32 %v627_v42, %v581_v32  ;;  %v769_v37 = vadd.f32 %v762_v54, %v1781_v51  ;;  %v986_v43 = vmul.f32 %v1532_v38, %v1859_v63 }
  0xa8   : > { %v1541_v8 = vpop.permute.xlu0 %1540  ;;  %v1909_v51 = vmul.f32 %v1478_v27, %v1840_v35 }
  0xa9   : > { %v1542_v10 = vunpack.i.l.bf16 %v1541_v8  ;;  %v1806_v11 = vpop.permute.xlu1 %1459  ;;  %v1543_v25 = vunpack.i.h.bf16 %v1541_v8  ;;  %v690_v8 = vmul.f32 %v1417_v46, %v1773_v44 }
  0xab   : > { %v579_v13 = vmul.f32 %v1542_v10, %v1765_v39  ;;  %v1810_v14 = vpop.permute.xlu2 %1503  ;;  %v580_v1 = vmul.f32 %v1543_v25, %v1765_v39  ;;  %v693_v10 = vmul.f32 %v1451_v50, %v1773_v44  ;;  %v697_v56 = vadd.f32 %v690_v8, %v630_v53 }
  0xac   : > { %v1506_v52 = vunpack.i.h.bf16 %v1810_v14 }
  0xad   : > { %v632_v16 = vadd.f32 %v625_v12, %v579_v13  ;;  %v633_v2 = vadd.f32 %v626_v47, %v580_v1  ;;  %v1462_v12 = vunpack.i.h.bf16 %v1806_v11  ;;  %v1291_v13 = vld [vmem:[%s2035_s6 + $0x6] sm:$0x1]  ;;  %v1452_v1 = vunpack.i.h.bf16 %v1796_v62 }
  0xae   : > { %v900_v29 = vunpack.c.l.bf16 %v1291_v13  ;;  %v1912_v62 = vmul.f32 %v1477_v28, %v1840_v35  ;;  %v1505_v28 = vunpack.i.l.bf16 %v1810_v14  ;;  %v1950_v14 = vld [vmem:[%s2036_s7] ss:$0 sm:$0xff] }
  0xaf   : > { %v1813_v17 = vadd.f32 %v692_v15, %v632_v16  ;;  %v583_v15 = vmul.f32 %v1416_v58, %v1765_v39  ;;  %v1877_v16 = vmul.f32 %v1483_v59, %v1840_v35  ;;  %v700_v23 = vadd.f32 %v693_v10, %v633_v2  ;;  %v1293_v39 = vld [vmem:[%s2035_s6 + $0x8] sm:$0x1] }
  0xb0   : > { %v1843_v40 = vpop.permute.xlu0 %1545  ;;  %v760_v0 = vmul.f32 %v1462_v12, %v1838_v34  ;;  %v1013_v32 = vunpack.c.l.bf16 %v1293_v39  ;;  %v1904_v49 = vperm.slane %v900_v29, 0  ;;  %v694_v61 = vmul.f32 %v1452_v1, %v1773_v44 }
  0xb1   : > { %v1815_v18 = vpop.permute.xlu1 %1469  ;;  %v1547_v4 = vunpack.i.l.bf16 %v1843_v40  ;;  %v636_v30 = vadd.f32 %v629_v9, %v583_v15  ;;  %v1495_v2 = vunpack.i.h.bf16 %v1800_v3  ;;  %v1461_v39 = vunpack.i.l.bf16 %v1806_v11 }
  0xb2   : > { %v1471_v42 = vunpack.i.l.bf16 %v1815_v18  ;;  %v767_v46 = vadd.f32 %v760_v0, %v700_v23  ;;  %v1472_v48 = vunpack.i.h.bf16 %v1815_v18  ;;  %v876_v0 = vmul.f32 %v1506_v52, %v1861_v45 }
  0xb3   : > { %v1817_v19 = vpop.permute.xlu2 %1513  ;;  %v757_v24 = vmul.f32 %v1547_v4, %v1838_v34  ;;  %v703_v59 = vadd.f32 %v696_v6, %v636_v30  ;;  %v1918_v4 = vperm.slane %v1013_v32, 0 }
  0xb4   : > { %v763_v18 = vmul.f32 %v1471_v42, %v1838_v34  ;;  %v813_v53 = vadd.f32 %v806_v20, %v767_v46  ;;  %v870_v6 = vmul.f32 %v1472_v48, %v1861_v45  ;;  %v701_v20 = vadd.f32 %v694_v61, %v1864_v5 }
  0xb5   : > { %v764_v47 = vadd.f32 %v757_v24, %v697_v56  ;;  %v1494_v24 = vunpack.i.l.bf16 %v1800_v3  ;;  %v1548_v56 = vunpack.i.h.bf16 %v1843_v40  ;;  %v1942_v5 = vmul.f32 %v1495_v2, %v1861_v45 }
  0xb6   : > { %v770_v27 = vadd.f32 %v763_v18, %v703_v59  ;;  %v875_v48 = vmul.f32 %v1505_v28, %v1861_v45 }
  0xb7   : > { %v810_v9 = vadd.f32 %v803_v57, %v764_v47  ;;  %v768_v57 = vadd.f32 %v761_v26, %v701_v20  ;;  %v1953_v40 = vmul.f32 %v1494_v24, %v1861_v45 }
  0xb8   : > { %v1895_v31 = vpop.permute.xlu0 %1550 }
  0xb9   : > { %v1552_v50 = vunpack.i.l.bf16 %v1895_v31  ;;  %v877_v29 = vadd.f32 %v870_v6, %v810_v9  ;;  %v1553_v20 = vunpack.i.h.bf16 %v1895_v31 }
  0xba   : > { %v1835_v33 = vpop.permute.xlu1 %1486 }
  0xbb   : > { %v1489_v58 = vunpack.i.h.bf16 %v1835_v33  ;;  %v937_v12 = vmul.f32 %v1552_v50, %v1904_v49  ;;  %v1488_v13 = vunpack.i.l.bf16 %v1835_v33 }
  0xbc   : > { %v1845_v41 = vpop.permute.xlu2 %1524 }
  0xbd   : > { %v809_v44 = vmul.f32 %v1489_v58, %v1840_v35  ;;  %v1526_v54 = vunpack.i.l.bf16 %v1845_v41  ;;  %v944_v3 = vadd.f32 %v937_v12, %v877_v29 }
  0xbf   : > { %v816_v1 = vadd.f32 %v809_v44, %v770_v27  ;;  %v983_v11 = vmul.f32 %v1526_v54, %v1859_v63  ;;  %v1515_v54 = vunpack.i.l.bf16 %v1817_v19 }
  0xc0   : > { %v1945_v42 = vpop.permute.xlu0 %1573 }
  0xc1   : > { %v1576_v2 = vunpack.i.h.bf16 %v1945_v42  ;;  %v990_v26 = vadd.f32 %v983_v11, %v944_v3  ;;  %v941_v29 = vmul.f32 %v1515_v54, %v1904_v49  ;;  %v938_v11 = vmul.f32 %v1553_v20, %v1904_v49 }
  0xc3   : > { %v1881_v21 = vpop.permute.xlu1 %1498 }
  0xc4   : > { %v1889_v25 = vpop.permute.xlu2 %979  ;;  %v1500_v36 = vunpack.i.l.bf16 %v1881_v21  ;;  %v1501_v46 = vunpack.i.h.bf16 %v1881_v21 }
  0xc6   : > { %v873_v60 = vmul.f32 %v1500_v36, %v1861_v45  ;;  %v808_v36 = vmul.f32 %v1488_v13, %v1840_v35  ;;  %v759_v35 = vmul.f32 %v1461_v39, %v1838_v34 }
  0xc8   : > { %v880_v38 = vadd.f32 %v873_v60, %v813_v53  ;;  %v758_v60 = vmul.f32 %v1548_v56, %v1838_v34  ;;  %v815_v61 = vadd.f32 %v808_v36, %v769_v37  ;;  %v766_v9 = vadd.f32 %v759_v35, %v1813_v17 }
  0xc9   : > { %v1516_v53 = vunpack.i.h.bf16 %v1817_v19  ;;  %v814_v34 = vadd.f32 %v1877_v16, %v768_v57  ;;  %v989_v37 = vmul.f32 %v1859_v63, %v1889_v25  ;;  %v1056_v17 = vmul.f32 %v1576_v2, %v1918_v4 }
  0xca   : > { %v765_v13 = vadd.f32 %v758_v60, %v1804_v7 }
  0xcb   : > { %v1920_v8 = vpop.permute.xlu1 %1508  ;;  %v942_v7 = vmul.f32 %v1516_v53, %v1904_v49 }
  0xcc   : > { %v1511_v10 = vunpack.i.h.bf16 %v1920_v8  ;;  %v1510_v24 = vunpack.i.l.bf16 %v1920_v8 }
  0xcd   : > { %v1928_v15 = vpop.permute.xlu2 %1568 }
  0xce   : > { %v940_v22 = vmul.f32 %v1511_v10, %v1904_v49  ;;  %v1570_v23 = vunpack.i.l.bf16 %v1928_v15  ;;  %v874_v10 = vmul.f32 %v1501_v46, %v1861_v45  ;;  %v1571_v19 = vunpack.i.h.bf16 %v1928_v15 }
  0xd0   : > { %v947_v33 = vadd.f32 %v940_v22, %v880_v38  ;;  %v1053_v30 = vmul.f32 %v1570_v23, %v1918_v4  ;;  %v882_v38 = vadd.f32 %v875_v48, %v815_v61  ;;  %v812_v22 = vadd.f32 %v1909_v51, %v766_v9 }
  0xd1   : > { %v881_v23 = vadd.f32 %v874_v10, %v814_v34  ;;  %v1054_v8 = vmul.f32 %v1571_v19, %v1918_v4 }
  0xd2   : > { %v993_v32 = vadd.f32 %v986_v43, %v947_v33  ;;  %v883_v43 = vadd.f32 %v876_v0, %v816_v1  ;;  %v1575_v33 = vunpack.i.l.bf16 %v1945_v42  ;;  %v811_v0 = vadd.f32 %v1912_v62, %v765_v13 }
  0xd3   : > { %v1519_v47 = vpop.permute.xlu1 %1518  ;;  %v949_v31 = vadd.f32 %v942_v7, %v882_v38  ;;  %v948_v1 = vadd.f32 %v941_v29, %v881_v23  ;;  %v939_v42 = vmul.f32 %v1510_v24, %v1904_v49 }
  0xd4   : > { %v1060_v50 = vadd.f32 %v1053_v30, %v993_v32  ;;  %v1521_v58 = vunpack.i.h.bf16 %v1519_v47  ;;  %v1520_v59 = vunpack.i.l.bf16 %v1519_v47  ;;  %v1527_v32 = vunpack.i.h.bf16 %v1845_v41 }
  0xd5   : > { %v1055_v62 = vmul.f32 %v1575_v33, %v1918_v4  ;;  %v1531_v47 = vunpack.i.l.bf16 %v1789_v55  ;;  %v878_v48 = vadd.f32 %v1953_v40, %v811_v0 }
  0xd6   : > { %v1071_v18 = vadd.f32 %v1950_v14, %v1060_v50  ;;  %v1050_v52 = vmul.f32 %v1521_v58, %v1918_v4  ;;  %v943_v21 = vmul.f32 %v1520_v59, %v1904_v49  ;;  %v879_v50 = vadd.f32 %v1942_v5, %v812_v22 }
  0xd7   : > { %v945_v41 = vadd.f32 %v938_v11, %v878_v48  ;;  %v984_v61 = vmul.f32 %v1527_v32, %v1859_v63  ;;  %v985_v40 = vmul.f32 %v1531_v47, %v1859_v63 }
  0xd8   : > { %v1078_v6 = vmax.f32 %v1071_v18, 0.0  ;;  %v950_v12 = vadd.f32 %v943_v21, %v883_v43  ;;  %v1057_v44 = vadd.f32 %v1050_v52, %v990_v26  ;;  %v946_v49 = vadd.f32 %v939_v42, %v879_v50 }
  0xd9   : > { %v991_v21 = vadd.f32 %v984_v61, %v945_v41 }
  0xda   : > { %v1085_v45 = vpack.c.bf16 %v1078_v6, %v1078_v6  ;;  %v996_v16 = vadd.f32 %v989_v37, %v950_v12  ;;  %v1068_v25 = vadd.f32 %v1950_v14, %v1057_v44  ;;  %v992_v53 = vadd.f32 %v985_v40, %v946_v49 }
  0xdc   : > { %1093 = vst.msk [vmem:[%s1975_s14 + $0xc] sm:$0xf] %vm1089_vm0, %v1085_v45  ;;  %v1063_v39 = vadd.f32 %v1056_v17, %v996_v16  ;;  %v1075_v27 = vmax.f32 %v1068_v25, 0.0  ;;  %v1557_v28 = vpop.permute.xlu1 %1556 }
  0xdd   : > { %v1559_v51 = vunpack.i.h.bf16 %v1557_v28  ;;  %v1558_v30 = vunpack.i.l.bf16 %v1557_v28 }
  0xde   : > { %v1074_v15 = vadd.f32 %v1950_v14, %v1063_v39  ;;  %v1082_v56 = vpack.c.bf16 %v1075_v27, %v1075_v27 }
  0xdf   : > { %v988_v36 = vmul.f32 %v1559_v51, %v1859_v63  ;;  %v987_v3 = vmul.f32 %v1558_v30, %v1859_v63 }
  0xe0   : > { %v1081_v57 = vmax.f32 %v1074_v15, 0.0  ;;  %1090 = vst.msk [vmem:[%s1975_s14] sm:$0xf] %vm1089_vm0, %v1082_v56 }
  0xe1   : > { %v994_v35 = vadd.f32 %v987_v3, %v948_v1  ;;  %v995_v46 = vadd.f32 %v988_v36, %v949_v31 }
  0xe2   : > { %v1088_v58 = vpack.c.bf16 %v1081_v57, %v1081_v57 }
  0xe3   : > { %v1061_v59 = vadd.f32 %v1054_v8, %v994_v35  ;;  %v1062_v60 = vadd.f32 %v1055_v62, %v995_v46 }
  0xe4   : > { %1096 = vst.msk [vmem:[%s1975_s14 + $0x18] sm:$0xf] %vm1089_vm0, %v1088_v58 }
  0xe5   : > { %v1072_v2 = vadd.f32 %v1950_v14, %v1061_v59  ;;  %v1073_v43 = vadd.f32 %v1950_v14, %v1062_v60  ;;  %v1563_v55 = vpop.permute.xlu1 %1562 }
  0xe6   : > { %v1565_v26 = vunpack.i.h.bf16 %v1563_v55  ;;  %v1564_v5 = vunpack.i.l.bf16 %v1563_v55 }
  0xe7   : > { %v1079_v18 = vmax.f32 %v1072_v2, 0.0  ;;  %v1080_v52 = vmax.f32 %v1073_v43, 0.0 }
  0xe8   : > { %v1052_v9 = vmul.f32 %v1565_v26, %v1918_v4  ;;  %v1051_v10 = vmul.f32 %v1564_v5, %v1918_v4 }
  0xe9   : > { %v1086_v34 = vpack.c.bf16 %v1079_v18, %v1079_v18  ;;  %v1087_v37 = vpack.c.bf16 %v1080_v52, %v1080_v52 }
  0xea   : > { %v1058_v6 = vadd.f32 %v1051_v10, %v991_v21  ;;  %v1059_v12 = vadd.f32 %v1052_v9, %v992_v53 }
  0xeb   : > { %1094 = vst.msk [vmem:[%s1975_s14 + $0x10] sm:$0xf] %vm1089_vm0, %v1086_v34 }
  0xec   : > { %1095 = vst.msk [vmem:[%s1975_s14 + $0x14] sm:$0xf] %vm1089_vm0, %v1087_v37  ;;  %v1069_v63 = vadd.f32 %v1950_v14, %v1058_v6  ;;  %v1070_v44 = vadd.f32 %v1950_v14, %v1059_v12 }
  0xee   : > { %v1076_v13 = vmax.f32 %v1069_v63, 0.0  ;;  %v1077_v54 = vmax.f32 %v1070_v44, 0.0 }
  0xf0   : > { %v1083_v38 = vpack.c.bf16 %v1076_v13, %v1076_v13  ;;  %v1084_v17 = vpack.c.bf16 %v1077_v54, %v1077_v54 }
  0xf2   : > { %1091 = vst.msk [vmem:[%s1975_s14 + $0x4] sm:$0xf] %vm1089_vm0, %v1083_v38 }
  0xf3   : > { %1092 = vst.msk [vmem:[%s1975_s14 + $0x8] sm:$0xf] %vm1089_vm0, %v1084_v17 }
  0xf4 PF: > { %s18_s29 = sadd.s32 1, %s1600_s29   ;;  %s2038_s27 = smov %s1596_s28 }
  0xf5   : > { %p15_p5 = scmp.ge.s32.totalorder %s18_s29, 4   ;;  %s2039_s28 = smov %s2041_s30 }
  0xf7   :  { %17 = sbr.rel (!%p15_p5) target bundleno = 2 (0x2), region = 105 }

// kernel: conv2d_av_subsampling.5
= control target key start
LH: loop header
LB: loop body
LE: loop exit
PB: predicated region body
PF: predicated region fallthrough
CT: control target
= control target key end

     0   :  { %s1088_s0 = inlined_call_operand.vmem [shape: bf16[2,4,96], index: 0, kind: input, shape index: {}]   ;;  %s1089_s1 = inlined_call_operand.vmem [shape: bf16[2,4,64], index: 1, kind: input, shape index: {}]   ;;  %s1090_s2 = inlined_call_operand.vmem [shape: bf16[96,64], index: 2, kind: input, shape index: {}]   ;;  %s1091_s3 = inlined_call_operand.vmem [shape: f32[1,64], index: 3, kind: input, shape index: {}]   ;;  %s1092_s4 = inlined_call_operand.vmem [shape: bf16[64,32], index: 4, kind: input, shape index: {}]   ;;  %s1093_s5 = inlined_call_operand.vmem [shape: bf16[64,32], index: 5, kind: input, shape index: {}]   ;;  %s1094_s6 = inlined_call_operand.vmem [shape: f32[1,32], index: 6, kind: input, shape index: {}]   ;;  %s1095_s7 = inlined_call_operand.vmem [shape: f32[4,32], index: 7, kind: input, shape index: {}]   ;;  %s1096_s8 = inlined_call_operand.hbm [shape: f32[2,4,32], index: 8, kind: output, shape index: {}]  }
   0x1   :  { %1097 = sst [smem:[#allocation5_spill]] %s1088_s0 }
   0x2   :  { %13 = vsyncpa [#allocation3], 0 }
   0x3   :  { %15 = vsyncpa [#allocation3 + $0x1], 0  ;;  %s937_s27 = smov 0   ;;  %s939_s28 = smov 0  }
   0x4   :  { %s941_s29 = smov 0   ;;  %s943_s30 = smov 0  }
   0x5   :  { %s945_s9 = smov 0   ;;  %s947_s10 = smov 0  }
   0x6 LB: > { %s669_s11 = sadd.s32 4294967295, %s890_s10   ;;  %s670_s12 = sadd.s32 4294967294, %s890_s10   ;;  %s890_s10 = sphi %s947_s10, %s21_s10   ;;  %s886_s9 = sphi %s945_s9, %s1105_s9   ;;  %s882_s30 = sphi %s943_s30, %s1104_s30   ;;  %s878_s29 = sphi %s941_s29, %s1103_s29   ;;  %s874_s28 = sphi %s939_s28, %s1102_s28   ;;  %s870_s27 = sphi %s937_s27, %s1101_s27  }
   0x7   : > { %s33_s13 = sadd.s32 1, %s886_s9  ;;  %s229_s14 = sadd.s32 1, %s878_s29 }
   0x8   : > { %p35_p0 = scmp.ge.s32.totalorder %s33_s13, 2  ;;  %p239_p1 = scmp.ne.s32.totalorder %s878_s29, %s874_s28 }
   0x9   : > { %p240_p2 = scmp.eq.s32.totalorder %s669_s11, 1  ;;  %p245_p3 = scmp.ne.s32.totalorder %s874_s28, %s870_s27 }
   0xa   : > { %s1107_s13 = smov (%p35_p0, %s33_s13), 0  ;;  %p246_p5 = scmp.eq.s32.totalorder %s670_s12, 1 }
   0xb   : > { %p977_p4 = por %p240_p2, %p239_p1  ;;  %s224_s16 = ssub.s32 %s886_s9, %s1107_s13 }
   0xc   : > { %p674_p6 = scmp.ge.s32.totalorder %s890_s10, 1  ;;  %p227_p7 = scmp.eq.s32.totalorder %s224_s16, 0 }
   0xd   : > { %p984_p8 = por %p246_p5, %p245_p3  ;;  %p306_p9 = scmp.lt.s32.totalorder %s890_s10, 3 }
   0xe   : > { %s990_s18 = scalar_select %p227_p7, %s878_s29, %s229_s14  }
   0xf   : > { %p307_p10 = pnand %p674_p6, %p306_p9 }
  0x10   : > { %p353_p11 = scmp.lt.s32.totalorder (!%p307_p10), %s882_s30, 1  ;;  %s1100_s0 = sld [smem:[#allocation5_spill]] (!%p307_p10) }
  0x11   : > { %310 = sbr.rel (%p307_p10) target bundleno = 319 (0x13f), region = 52 }
  0x16   : > { %v746_v0 = vld [vmem:[%s1090_s2 + $0x28] sm:$0xff]  ;;  %v745_v1 = vld [vmem:[%s1090_s2 + $0x20] sm:$0xff]  ;;  %v754_v2 = vld [vmem:[%s1093_s5 + $0x18] sm:$0xff]  ;;  %s354_s11 = scalar_select %p353_p11, %s882_s30, 1  ;;  %vm425_vm0 = vcmask 785408   ;;  %vm484_vm1 = vcmask 523264  }
  0x17   : > { %431 = vmatpush.bf16.msra.mxu0 %v746_v0  ;;  %v750_v3 = vld [vmem:[%s1092_s4 + $0x18] sm:$0xff]  ;;  %492 = vmatpush.bf16.msra.mxu1 %v754_v2  ;;  %v753_v4 = vld [vmem:[%s1093_s5 + $0x10] sm:$0xff]  ;;  %v752_v7 = vld [vmem:[%s1093_s5 + $0x8] sm:$0xff]  ;;  %vm549_vm2 = vcmask 257024  }
  0x18   : > { %532 = vmatpush.bf16.msra.mxu2 %v750_v3  ;;  %v749_v5 = vld [vmem:[%s1092_s4 + $0x10] sm:$0xff]  ;;  %v744_v6 = vld [vmem:[%s1090_s2 + $0x18] sm:$0xff]  ;;  %v748_v8 = vld [vmem:[%s1092_s4 + $0x8] sm:$0xff]  ;;  %s676_s16 = sshll.u32 %s354_s11, 1 }
  0x19   : > { %v743_v9 = vld [vmem:[%s1090_s2 + $0x10] sm:$0xff]  ;;  %v742_v10 = vld [vmem:[%s1090_s2 + $0x8] sm:$0xff]  ;;  %v741_v11 = vld [vmem:[%s1090_s2] sm:$0xff]  ;;  %s359_s23 = scalar_lea.vmem %s1100_s0, %s676_s16  ;;  %s366_s11 = scalar_lea.vmem %s1089_s1, %s676_s16 }
  0x1a   : > { %v372_v12 = vld [vmem:[%s359_s23] sm:$0x3]  ;;  %s350_s16 = sand.u32 1, %s874_s28   ;;  %s738_s23 = sshll.u32 %s882_s30, 2 }
  0x1b   : > { %432 = vmatpush.bf16.msra.mxu0 %v745_v1  ;;  %493 = vmatpush.bf16.msra.mxu1 %v753_v4  ;;  %v751_v13 = vld [vmem:[%s1093_s5] sm:$0xff]  ;;  %s675_s22 = sshll.u32 %s350_s16, 2  ;;  %s552_s30 = scalar_lea.sflag [#allocation3], %s350_s16 }
  0x1c   : > { %533 = vmatpush.bf16.msra.mxu2 %v749_v5  ;;  %v747_v14 = vld [vmem:[%s1092_s4] sm:$0xff]  ;;  %s352_s20 = scalar_lea.vmem [#allocation2], %s675_s22  ;;  %s832_s22 = scalar_lea.hbm %s1096_s8, 8 }
  0x1d   : > { %v451_v15 = vld [vmem:[%s366_s11] sm:$0x3]  ;;  %s563_s11 = scalar_lea.hbm %s1096_s8, %s738_s23  ;;  %s565_s21 = sshll.u32 %s352_s20, 4  ;;  %s566_s21 = int_to_ptr.vmem [resolvable:$true] %s565_s21 }
  0x1e   : > { %v810_v16 = vld [vmem:[%s1091_s3] ss:$0 sm:$0xff]  ;;  %s567_s0 = sshll.u32 %s563_s11, 4  ;;  %s568_s0 = int_to_ptr.hbm [resolvable:$true] %s567_s0 }
  0x1f   : > { %433 = vmatpush.bf16.msra.mxu0 %v744_v6  ;;  %494 = vmatpush.bf16.msra.mxu1 %v752_v7  ;;  %v811_v23 = vld [vmem:[%s1094_s6] ss:$0 sm:$0xff]  ;;  %s826_s24 = sshra.s32 %s568_s0, 4  ;;  %s827_s24 = int_to_ptr.hbm [resolvable:$true] %s826_s24 }
  0x20   : > { %534 = vmatpush.bf16.msra.mxu2 %v748_v8  ;;  %v547_v27 = vld [vmem:[%s1095_s7] sm:$0xf]  ;;  %s828_s23 = scalar_lea.hbm %s827_s24, 4  ;;  %p833_p1 = scmp.lt.s32.totalorder %s827_s24, %s1096_s8 }
  0x21   : > { %p829_p12 = scmp.ne.s32.totalorder %s827_s24, %s828_s23  ;;  %p834_p2 = scmp.lt.s32.totalorder %s832_s22, %s828_s23 }
  0x23   : > { %434 = vmatpush.bf16.msra.mxu0 %v743_v9  ;;  %495 = vmatpush.bf16.msra.mxu1 %v751_v13  ;;  %p830_p13 = pnand %p829_p12, %p977_p4  ;;  %p835_p3 = por %p834_p2, %p833_p1 }
  0x24   : > { %535 = vmatpush.bf16.msra.mxu2 %v747_v14 }
  0x25   : > { %p831_p0 = pneg %p830_p13 }
  0x26   : > { %719 = vmatmul.msk.bf16.vlgmr.msra.gmra.mxu1 %vm484_vm1, %v451_v15 }
  0x27   : > { %435 = vmatpush.bf16.msra.mxu0 %v742_v10  ;;  %p836_p5 = pnand %p835_p3, %p831_p0 }
  0x2b   : > { %436 = vmatpush.bf16.msra.mxu0 %v741_v11 }
  0x2e   : > { %702 = vmatmul.msk.bf16.vlgmr.msra.gmra.mxu0 %vm425_vm0, %v372_v12 }
  0xa3   : > { %v497_v21 = vpop.f32.mrf.mxu1 }
  0xab   : > { %v438_v17 = vpop.f32.mrf.mxu0  ;;  %v499_v22 = vpop.f32.mrf.mxu1 }
  0xac   : > { %v439_v18 = vadd.f32 %v810_v16, %v438_v17 }
  0xae   : > { %v442_v19 = vpack.c.bf16 %v439_v18, %v439_v18 }
  0xb0   : > { %736 = vmatmul.msk.bf16.vlgmr.msra.gmra.mxu2 %vm484_vm1, %v442_v19 }
  0xb3   : > { %v440_v20 = vpop.f32.mrf.mxu0 }
 0x133   : > { %v537_v24 = vpop.f32.mrf.mxu2 }
 0x134   : > { %v538_v25 = vadd.f32 %v537_v24, %v497_v21 }
 0x136   : > { %v545_v26 = vadd.f32 %v811_v23, %v538_v25 }
 0x138   : > { %v546_v28 = vmul.f32 5.656854, %v545_v26 }
 0x13a   : > { %v548_v29 = vadd.f32 %v547_v27, %v546_v28 }
 0x13b   : > { %v539_v30 = vpop.f32.mrf.mxu2 }
 0x13c   : > { %550 = vst.msk [vmem:[%s352_s20] sm:$0xf] %vm549_vm2, %v548_v29 }
 0x13d   : > { %839 = shalt.err (!%p836_p5)
}
 0x13e   : > { %755 = dma.vmem_to_hbm [thread:$0]  (%p977_p4), %s566_s21, 64, %s568_s0, %s552_s30  }
 0x13f PF: > { %p761_p6 = scmp.ge.s32.totalorder %s890_s10, 2  ;;  %s579_s16 = sand.u32 1, %s870_s27  }
 0x140   : > { %s580_s14 = scalar_lea.sflag [#allocation3], %s579_s16 }
 0x141   : > { %p758_p7 = pnand %p761_p6, %p984_p8 }
 0x143   : > { %p759_p9 = pneg %p758_p7 }
 0x145   : > { %865 = dma.done.wait (%p759_p9), %s580_s14, 64  }
 0x146   : > { %867 = vsyncadd (%p759_p9), %s580_s14, 4294967232  ;;  %s21_s10 = sadd.s32 1, %s890_s10   ;;  %s1101_s27 = smov %s874_s28 }
 0x147   : > { %p18_p10 = scmp.ge.s32.totalorder %s21_s10, 4   ;;  %s1102_s28 = smov %s878_s29 }
 0x148   : > { %s1103_s29 = smov %s990_s18  ;;  %s1104_s30 = smov %s886_s9 }
 0x149   : > { %s1105_s9 = smov %s1107_s13  ;;  %20 = sbr.rel (!%p18_p10) target bundleno = 6 (0x6), region = 93 }
 0x14e   :  { %586 = vsyncpa [#allocation3], 1 }
 0x14f   :  { %588 = vsyncpa [#allocation3 + $0x1], 1 }

// kernel: conv2d_av_subsampling.4
= control target key start
LH: loop header
LB: loop body
LE: loop exit
PB: predicated region body
PF: predicated region fallthrough
CT: control target
= control target key end

     0   :  { %s1471_s27 = smov 0   ;;  %s1473_s28 = smov 0   ;;  %s1610_s0 = inlined_call_operand.vmem [shape: bf16[2,24,64], index: 0, kind: input, shape index: {}]   ;;  %s1611_s1 = inlined_call_operand.vmem [shape: bf16[2,24,64], index: 1, kind: input, shape index: {}]   ;;  %s1612_s2 = inlined_call_operand.vmem [shape: bf16[2,24,64], index: 2, kind: input, shape index: {}]   ;;  %s1613_s3 = inlined_call_operand.vmem [shape: bf16[2,24,64], index: 3, kind: input, shape index: {}]   ;;  %s1614_s4 = inlined_call_operand.vmem [shape: bf16[2,24,64], index: 4, kind: input, shape index: {}]   ;;  %s1615_s5 = inlined_call_operand.vmem [shape: bf16[2,24,64], index: 5, kind: input, shape index: {}]   ;;  %s1616_s6 = inlined_call_operand.vmem [shape: bf16[3,3,32,32], index: 6, kind: input, shape index: {}]   ;;  %s1617_s7 = inlined_call_operand.vmem [shape: f32[1,32], index: 7, kind: input, shape index: {}]   ;;  %s1618_s8 = inlined_call_operand.vmem [shape: bf16[2,24,32], index: 8, kind: output, shape index: {}]  }
   0x1   :  { %s1475_s29 = smov 0  }
   0x2 LB: > { %s30_s30 = sadd.s32 1, %s1419_s28  ;;  %p1192_p0 = scmp.ge.s32.totalorder %s1423_s29, 1  ;;  %s1423_s29 = sphi %s1475_s29, %s18_s29   ;;  %s1419_s28 = sphi %s1473_s28, %s1620_s28   ;;  %s1415_s27 = sphi %s1471_s27, %s1619_s27  }
   0x3   : > { %p32_p1 = scmp.ge.s32.totalorder %s30_s30, 2  ;;  %p368_p2 = scmp.lt.s32.totalorder %s1423_s29, 3 }
   0x5   : > { %s1622_s30 = smov (%p32_p1, %s30_s30), 0  ;;  %p369_p3 = pnand %p1192_p0, %p368_p2 }
   0x6   : > { %p456_p4 = scmp.lt.s32.totalorder (!%p369_p3), %s1415_s27, 1  ;;  %s1425_s25 = smov (!%p369_p3), 96  }
   0x7   : > { %372 = sbr.rel (%p369_p3) target bundleno = 343 (0x157), region = 52 }
   0xc   : > { %v1352_v0 = vld [vmem:[%s1616_s6 + $0x18] sm:$0xff]  ;;  %v1355_v1 = vld [vmem:[%s1616_s6 + $0x28] sm:$0xff]  ;;  %s1624_s27 = smov (!%p456_p4, %s1415_s27), 1  ;;  %v1351_v2 = vld [vmem:[%s1616_s6 + $0x10] sm:$0xff]  ;;  %vm562_vm0 = vcmask 261120   ;;  %vm1007_vm1 = vcmask 257024  }
   0xd   : > { %1372 = vmatpush.bf16.msra.mxu1 %v1352_v0  ;;  %663 = vmatpush.bf16.msra.mxu2 %v1355_v1  ;;  %s1498_s15 = smul.u32 12, %s1624_s27  ;;  %v1358_v15 = vld [vmem:[%s1616_s6 + $0x38] sm:$0xff]  ;;  %v1350_v16 = vld [vmem:[%s1616_s6 + $0x8] sm:$0xff]  ;;  %v1354_v17 = vld [vmem:[%s1616_s6 + $0x20] sm:$0xff] }
   0xe   : > { %575 = vmatpush.bf16.msra.mxu0 %v1352_v0  ;;  %718 = vmatpush.bf16.msra.mxu3 %v1358_v15  ;;  %v1357_v18 = vld [vmem:[%s1616_s6 + $0x30] sm:$0xff]  ;;  %v1360_v20 = vld [vmem:[%s1616_s6 + $0x48] sm:$0xff]  ;;  %v1349_v21 = vld [vmem:[%s1616_s6] sm:$0xff] }
   0xf   : > { %s463_s18 = scalar_lea.vmem %s1610_s0, %s1498_s15  ;;  %s483_s21 = scalar_lea.vmem %s1612_s2, %s1498_s15  ;;  %v1366_v22 = vld [vmem:[%s1616_s6 + $0x68] sm:$0xff]  ;;  %v1359_v23 = vld [vmem:[%s1616_s6 + $0x40] sm:$0xff]  ;;  %v1368_v24 = vld [vmem:[%s1616_s6 + $0x78] sm:$0xff] }
  0x10   : > { %v528_v3 = vld [vmem:[%s463_s18 + $0x8] sm:$0xf]  ;;  %v1356_v4 = vld [vmem:[%s483_s21] sm:$0xff]  ;;  %s503_s24 = scalar_lea.vmem %s1614_s4, %s1498_s15  ;;  %s473_s9 = scalar_lea.vmem %s1611_s1, %s1498_s15  ;;  %v1363_v29 = vld [vmem:[%s1616_s6 + $0x58] sm:$0xff] }
  0x11   : > { %1373 = vmatpush.bf16.msra.mxu1 %v1351_v2  ;;  %v543_v5 = vunpack.c.l.b16 %v528_v3  ;;  %v680_v6 = vld [vmem:[%s483_s21 + $0x8] sm:$0xf]  ;;  %v1364_v7 = vld [vmem:[%s503_s24] sm:$0xff]  ;;  %738 = vrot.lane.b32.xlu1 %v1356_v4, %s1425_s25  ;;  %v1367_v31 = vld [vmem:[%s1616_s6 + $0x70] sm:$0xff]  ;;  %s513_s10 = scalar_lea.vmem %s1615_s5, %s1498_s15 }
  0x12   : > { %576 = vmatpush.bf16.msra.mxu0 %v1351_v2  ;;  %v838_v8 = vld [vmem:[%s503_s24 + $0x8] sm:$0xf]  ;;  %v691_v9 = vunpack.c.l.b16 %v680_v6  ;;  %896 = vrot.lane.b32.xlu2 %v1364_v7, %s1425_s25  ;;  %v1348_v14 = vld [vmem:[%s463_s18] sm:$0xff]  ;;  %v1362_v32 = vld [vmem:[%s1616_s6 + $0x50] sm:$0xff] }
  0x13   : > { %v1512_v10 = vpack.c.b16 %v543_v5, %v543_v5  ;;  %v849_v11 = vunpack.c.l.b16 %v838_v8  ;;  %v1353_v19 = vld [vmem:[%s473_s9] sm:$0xff]  ;;  %664 = vmatpush.bf16.msra.mxu2 %v1354_v17  ;;  %719 = vmatpush.bf16.msra.mxu3 %v1357_v18  ;;  %v625_v25 = vld [vmem:[%s473_s9 + $0x8] sm:$0xf]  ;;  %s523_s9 = scalar_lea.vmem %s1618_s8, %s1498_s15 }
  0x14   : > { %v693_v12 = vpack.c.b16 %v691_v9, %v691_v9  ;;  %v636_v26 = vunpack.c.l.b16 %v625_v25  ;;  %v1365_v28 = vld [vmem:[%s1616_s6 + $0x60] sm:$0xff]  ;;  %v1371_v33 = vld [vmem:[%s1616_s6 + $0x88] sm:$0xff] }
  0x15   : > { %548 = vrot.lane.b32.xlu0 %v1512_v10, %s1425_s25  ;;  %v851_v13 = vpack.c.b16 %v849_v11, %v849_v11  ;;  %611 = vmatpush.bf16.msrb.mxu1 %v1350_v16  ;;  %v1370_v36 = vld [vmem:[%s1616_s6 + $0x80] sm:$0xff]  ;;  %v941_v45 = vld [vmem:[%s513_s10 + $0x8] sm:$0xf] }
  0x16   : > { %1244 = vmatmul.msk.bf16.vlgmr.msra.gmra.mxu2 %vm562_vm0, %v1353_v19  ;;  %1262 = vmatmul.msk.bf16.vlgmr.msra.gmra.mxu3 %vm562_vm0, %v1356_v4  ;;  %v638_v27 = vpack.c.b16 %v636_v26, %v636_v26  ;;  %v1369_v41 = vld [vmem:[%s513_s10] sm:$0xff]  ;;  %v952_v46 = vunpack.c.l.b16 %v941_v45 }
  0x17   : > { %766 = vmatpush.bf16.msrb.mxu0 %v1360_v20  ;;  %876 = vmatpush.bf16.msrb.mxu2 %v1366_v22 }
  0x18   : > { %924 = vmatpush.bf16.msrb.mxu3 %v1368_v24  ;;  %v954_v47 = vpack.c.b16 %v952_v46, %v952_v46 }
  0x19   : > { %740 = vrot.lane.b32.xlu1 %v693_v12, %s1425_s25  ;;  %612 = vmatpush.bf16.msrb.mxu1 %v1349_v21 }
  0x1a   : > { %898 = vrot.lane.b32.xlu2 %v851_v13, %s1425_s25 }
  0x1b   : > { %767 = vmatpush.bf16.msrb.mxu0 %v1359_v23  ;;  %877 = vmatpush.bf16.msrb.mxu2 %v1365_v28 }
  0x1c   : > { %925 = vmatpush.bf16.msrb.mxu3 %v1367_v31 }
  0x1d   : > { %546 = vrot.lane.b32.xlu0 %v1348_v14, %s1425_s25  ;;  %s493_s25 = scalar_lea.vmem %s1613_s3, %s1498_s15 }
  0x1e   : > { %v1361_v40 = vld [vmem:[%s493_s25] sm:$0xff]  ;;  %v783_v42 = vld [vmem:[%s493_s25 + $0x8] sm:$0xf] }
  0x1f   : > { %v794_v43 = vunpack.c.l.b16 %v783_v42 }
  0x21   : > { %v796_v44 = vpack.c.b16 %v794_v43, %v794_v43 }
  0x26   : > { %1245 = vmatmul.msk.bf16.gmra.mxu2 %vm562_vm0, %v638_v27  ;;  %1263 = vmatmul.msk.bf16.gmra.mxu3 %vm562_vm0, %v693_v12  ;;  %v1400_v27 = vld [vmem:[%s1617_s7] ss:$0 sm:$0xff] }
  0x36   : > { %1312 = vmatmul.msk.bf16.vlgmr.msrb.gmra.mxu2 %vm562_vm0, %v1364_v7 }
  0x46   : > { %1313 = vmatmul.msk.bf16.gmra.mxu2 %vm562_vm0, %v851_v13 }
  0x6c   : > { %v897_v34 = vpop.permute.xlu2 %896 }
  0x6d   : > { %1326 = vmatmul.msk.bf16.vlgmr.msrb.gmra.mxu3 %vm562_vm0, %v897_v34 }
  0x74   : > { %v899_v38 = vpop.permute.xlu2 %898 }
  0x7d   : > { %1327 = vmatmul.msk.bf16.gmra.mxu3 %vm562_vm0, %v899_v38 }
  0x83   : > { %v739_v37 = vpop.permute.xlu1 %738 }
  0x87   : > { %v549_v30 = vpop.permute.xlu0 %548 }
  0x88   : > { %1217 = vmatmul.msk.bf16.vlgmr.msra.gmra.mxu1 %vm562_vm0, %v549_v30 }
  0x89   : > { %821 = vmatpush.bf16.msra.mxu1 %v1363_v29 }
  0x8b   : > { %v741_v39 = vpop.permute.xlu1 %740 }
  0x8d   : > { %822 = vmatpush.bf16.msra.mxu1 %v1362_v32 }
  0x8f   : > { %v547_v35 = vpop.permute.xlu0 %546 }
  0x90   : > { %1216 = vmatmul.msk.bf16.vlgmr.msra.gmra.mxu0 %vm562_vm0, %v547_v35 }
  0x91   : > { %979 = vmatpush.bf16.msra.mxu0 %v1371_v33 }
  0x95   : > { %980 = vmatpush.bf16.msra.mxu0 %v1370_v36 }
  0x98   : > { %1226 = vmatmul.msk.bf16.vlgmr.msrb.gmra.mxu1 %vm562_vm0, %v1348_v14 }
  0x99   : > { %v666_v48 = vpop.f32.mrf.mxu2  ;;  %v721_v49 = vpop.f32.mrf.mxu3 }
  0xa0   : > { %1276 = vmatmul.msk.bf16.vlgmr.msrb.gmra.mxu0 %vm562_vm0, %v739_v37 }
  0xa1   : > { %v668_v50 = vpop.f32.mrf.mxu2  ;;  %v723_v51 = vpop.f32.mrf.mxu3 }
  0xa8   : > { %1227 = vmatmul.msk.bf16.gmra.mxu1 %vm562_vm0, %v1512_v10 }
  0xa9   : > { %v671_v52 = vpop.f32.mrf.mxu2  ;;  %v726_v53 = vpop.f32.mrf.mxu3 }
  0xb0   : > { %1277 = vmatmul.msk.bf16.gmra.mxu0 %vm562_vm0, %v741_v39 }
  0xb1   : > { %v673_v55 = vpop.f32.mrf.mxu2  ;;  %v728_v56 = vpop.f32.mrf.mxu3 }
  0xb8   : > { %1294 = vmatmul.msk.bf16.vlgmr.msra.gmra.mxu1 %vm562_vm0, %v1361_v40 }
  0xb9   : > { %v879_v59 = vpop.f32.mrf.mxu2 }
  0xc0   : > { %1344 = vmatmul.msk.bf16.vlgmr.msra.gmra.mxu0 %vm562_vm0, %v1369_v41 }
  0xc1   : > { %v881_v1 = vpop.f32.mrf.mxu2 }
  0xc8   : > { %1295 = vmatmul.msk.bf16.gmra.mxu1 %vm562_vm0, %v796_v44 }
  0xc9   : > { %v884_v8 = vpop.f32.mrf.mxu2 }
  0xd0   : > { %1345 = vmatmul.msk.bf16.gmra.mxu0 %vm562_vm0, %v954_v47 }
  0xd1   : > { %v886_v15 = vpop.f32.mrf.mxu2 }
  0xf0   : > { %v927_v60 = vpop.f32.mrf.mxu3 }
  0xf8   : > { %v929_v3 = vpop.f32.mrf.mxu3 }
 0x100   : > { %v932_v10 = vpop.f32.mrf.mxu3 }
 0x105   : > { %v583_v54 = vpop.f32.mrf.mxu1 }
 0x108   : > { %v934_v17 = vpop.f32.mrf.mxu3 }
 0x10d   : > { %v578_v57 = vpop.f32.mrf.mxu0  ;;  %v585_v58 = vpop.f32.mrf.mxu1 }
 0x115   : > { %v580_v61 = vpop.f32.mrf.mxu0  ;;  %v614_v62 = vpop.f32.mrf.mxu1 }
 0x116   : > { %v615_v63 = vadd.f32 %v614_v62, %v578_v57 }
 0x118   : > { %v675_v0 = vadd.f32 %v666_v48, %v615_v63 }
 0x11a   : > { %v730_v2 = vadd.f32 %v721_v49, %v675_v0 }
 0x11d   : > { %v616_v4 = vpop.f32.mrf.mxu1  ;;  %v769_v5 = vpop.f32.mrf.mxu0 }
 0x11e   : > { %v617_v6 = vadd.f32 %v616_v4, %v580_v61  ;;  %v778_v20 = vadd.f32 %v769_v5, %v730_v2 }
 0x120   : > { %v676_v7 = vadd.f32 %v668_v50, %v617_v6 }
 0x122   : > { %v731_v9 = vadd.f32 %v723_v51, %v676_v7 }
 0x125   : > { %v619_v11 = vpop.f32.mrf.mxu1  ;;  %v771_v12 = vpop.f32.mrf.mxu0 }
 0x126   : > { %v620_v13 = vadd.f32 %v619_v11, %v583_v54  ;;  %v779_v25 = vadd.f32 %v771_v12, %v731_v9 }
 0x128   : > { %v677_v14 = vadd.f32 %v671_v52, %v620_v13 }
 0x12a   : > { %v732_v16 = vadd.f32 %v726_v53, %v677_v14 }
 0x12d   : > { %v621_v18 = vpop.f32.mrf.mxu1  ;;  %v774_v19 = vpop.f32.mrf.mxu0 }
 0x12e   : > { %v780_v35 = vadd.f32 %v774_v19, %v732_v16 }
 0x135   : > { %v776_v21 = vpop.f32.mrf.mxu0  ;;  %v824_v22 = vpop.f32.mrf.mxu1 }
 0x136   : > { %v833_v23 = vadd.f32 %v824_v22, %v778_v20 }
 0x138   : > { %v888_v24 = vadd.f32 %v879_v59, %v833_v23 }
 0x13a   : > { %v936_v26 = vadd.f32 %v927_v60, %v888_v24 }
 0x13d   : > { %v826_v28 = vpop.f32.mrf.mxu1  ;;  %v982_v29 = vpop.f32.mrf.mxu0 }
 0x13e   : > { %v834_v30 = vadd.f32 %v826_v28, %v779_v25  ;;  %v991_v31 = vadd.f32 %v982_v29, %v936_v26 }
 0x140   : > { %v889_v32 = vadd.f32 %v881_v1, %v834_v30  ;;  %v998_v33 = vadd.f32 %v1400_v27, %v991_v31 }
 0x142   : > { %v1001_v34 = vmax.f32 %v998_v33, 0.0  ;;  %v937_v37 = vadd.f32 %v929_v3, %v889_v32 }
 0x144   : > { %v1004_v36 = vpack.c.bf16 %v1001_v34, %v1001_v34 }
 0x145   : > { %v829_v38 = vpop.f32.mrf.mxu1  ;;  %v984_v39 = vpop.f32.mrf.mxu0 }
 0x146   : > { %1008 = vst.msk [vmem:[%s523_s9] sm:$0xf] %vm1007_vm1, %v1004_v36  ;;  %v835_v40 = vadd.f32 %v829_v38, %v780_v35  ;;  %v992_v41 = vadd.f32 %v984_v39, %v937_v37 }
 0x148   : > { %v890_v42 = vadd.f32 %v884_v8, %v835_v40  ;;  %v999_v43 = vadd.f32 %v1400_v27, %v992_v41 }
 0x14a   : > { %v1002_v44 = vmax.f32 %v999_v43, 0.0  ;;  %v938_v46 = vadd.f32 %v932_v10, %v890_v42 }
 0x14c   : > { %v1005_v45 = vpack.c.bf16 %v1002_v44, %v1002_v44 }
 0x14d   : > { %v831_v47 = vpop.f32.mrf.mxu1  ;;  %v987_v48 = vpop.f32.mrf.mxu0 }
 0x14e   : > { %1009 = vst.msk [vmem:[%s523_s9 + $0x4] sm:$0xf] %vm1007_vm1, %v1005_v45  ;;  %v993_v49 = vadd.f32 %v987_v48, %v938_v46 }
 0x150   : > { %v1000_v50 = vadd.f32 %v1400_v27, %v993_v49 }
 0x152   : > { %v1003_v51 = vmax.f32 %v1000_v50, 0.0 }
 0x154   : > { %v1006_v52 = vpack.c.bf16 %v1003_v51, %v1003_v51 }
 0x155   : > { %v989_v53 = vpop.f32.mrf.mxu0 }
 0x156   : > { %1010 = vst.msk [vmem:[%s523_s9 + $0x8] sm:$0xf] %vm1007_vm1, %v1006_v52 }
 0x157 PF: > { %s18_s29 = sadd.s32 1, %s1423_s29   ;;  %s1619_s27 = smov %s1419_s28 }
 0x158   : > { %p15_p5 = scmp.ge.s32.totalorder %s18_s29, 4   ;;  %s1620_s28 = smov %s1622_s30 }
 0x15a   :  { %17 = sbr.rel (!%p15_p5) target bundleno = 2 (0x2), region = 105 }

</bundles_post_ra>
